<compile_context>
chip_gen: v7x
topology: tpu7x:2x2x1
jax: 0.10.0
libtpu: 0.0.40
codegen_flags: <defaults>
</compile_context>

<pallas_src>
import jax
import jax.numpy as jnp
from jax import lax
from jax.experimental import pallas as pl
from jax.experimental.pallas import tpu as pltpu

# ---- small, module-consistent sizes (synthetic) ----
VOCAB_SIZE = 32        # toy stand-in for len(vocab)
EMBED_DIM = 64         # stand-in for EMBEDDING_DIM=50 (padded to a lane-friendly size)
HIDDEN_SIZE = 128      # matches the module's HIDDEN_SIZE=128 (keeps gate slices lane-aligned)
NUM_TAGS = 8           # stand-in for len(POS_TAGS)
BATCH = 16
SEQ_LEN = 8


def _tensorcores_per_pallas_grid() -> int:
    """TensorCores reachable from one Pallas grid via dimension_semantics ('megacore')."""
    try:
        kind = jax.devices()[0].device_kind.lower()
    except Exception:
        return 1
    # v4 / v5p / v7x expose 2 TensorCores behind one device; v5e / v6e expose 1.
    return 2 if any(tag in kind for tag in ("v4", "v5p", "v7")) else 1


def _sigmoid(x):
    # sigmoid(x) = 0.5 * (tanh(x/2) + 1): a single EUP op + cheap VPU ops -> shorter dependent
    # chain on the serial critical path than exp + add + exact reciprocal.
    return 0.5 * (jnp.tanh(0.5 * x) + 1.0)


def _lstm_cell(gates, c, H):
    # Lane-aligned slices (H = 128): no cross-lane relayouts on the serial path.
    i = _sigmoid(gates[:, 0:H])
    f = _sigmoid(gates[:, H:2 * H])
    g = jnp.tanh(gates[:, 2 * H:3 * H])
    o = _sigmoid(gates[:, 3 * H:4 * H])
    c_new = f * c + i * g
    return o * jnp.tanh(c_new), c_new


def rnn_kernel(ids_ref, gtab_f_ref, gtab_b_ref, whh_f_ref,
               wlin_f_ref, wlin_b_ref, blin_ref,
               out_ref, gin_ref):
    # ids_ref block: (1, T*Bb, 1) int32, time-major within the batch block (row = t*Bb + b)
    ids_col = ids_ref[0]                                   # (T*Bb, 1)
    TB = ids_col.shape[0]
    V = gtab_f_ref.shape[0]
    H = whh_f_ref.shape[0]                                 # W_hh is (H, 4H)
    Bb = out_ref.shape[0]
    T = TB // Bb

    # ---------- hoisted, non-recurrent work ----------
    # One-hot @ fused (emb @ W_ih^T + b_ih + b_hh) table == exact row gather (one non-zero per
    # row, f32 accumulation of bf16 table entries), producing every timestep's input gates in a
    # single MXU op.  Stored once in a VMEM scratch so the serial loop only reads it.
    lane_iota = lax.broadcasted_iota(jnp.int32, (TB, V), 1)
    onehot = (ids_col == lane_iota).astype(jnp.bfloat16)   # (T*Bb, V)
    gin_ref[...] = jnp.dot(onehot, gtab_f_ref[...],
                           preferred_element_type=jnp.float32)       # (T*Bb, 4H) f32

    # Reverse direction at the last output position: h0 = c0 = 0, so only x_{T-1} matters
    # (the h @ W_hh_b term is exactly zero and is skipped entirely).  Valid ONLY because
    # downstream consumes out[:, -1, :].
    g_b = jnp.dot(onehot[(T - 1) * Bb:, :], gtab_b_ref[...],
                  preferred_element_type=jnp.float32)                 # (Bb, 4H)

    # ---------- serial forward recurrence: one bf16 MXU matmul per step ----------
    whh_f = whh_f_ref[...]                                 # bf16 (H, 4H)

    # step 0: h = 0, so the recurrent term is exactly zero -> skip the matmul.
    h0, c0 = _lstm_cell(gin_ref[0:Bb, :], jnp.zeros((Bb, H), jnp.float32), H)

    def step(t, carry):
        h, c = carry
        row = pl.multiple_of(t * Bb, Bb)                   # aligned, unmasked scratch load
        gates = gin_ref[pl.ds(row, Bb), :] + jnp.dot(
            h.astype(jnp.bfloat16), whh_f, preferred_element_type=jnp.float32)
        return _lstm_cell(gates, c, H)

    h_fwd, _ = lax.fori_loop(1, T, step, (h0, c0), unroll=True)

    h_bwd, _ = _lstm_cell(g_b, jnp.zeros((Bb, H), jnp.float32), H)

    # Final linear without a lane-dim concat: w_lin pre-split -> two small matmuls + add.
    logits = (jnp.dot(h_fwd.astype(jnp.bfloat16), wlin_f_ref[...],
                      preferred_element_type=jnp.float32)
              + jnp.dot(h_bwd.astype(jnp.bfloat16), wlin_b_ref[...],
                        preferred_element_type=jnp.float32)
              + blin_ref[...])                              # (Bb, NUM_TAGS)

    # log_softmax over the last dim (default F.log_softmax dim for 2-D input).
    # TODO(synk): present a lane-dense (128-padded) output block if NUM_TAGS / batch grows.
    m = jnp.max(logits, axis=-1, keepdims=True)
    z = logits - m
    out_ref[...] = z - jnp.log(jnp.sum(jnp.exp(z), axis=-1, keepdims=True))


def rnn_forward(ids, params):
    B, T = ids.shape
    H = params["whh_f"].shape[0]
    C = params["blin"].shape[1]

    # Generation-aware batch blocking: exactly one batch block per TensorCore so the
    # latency-bound serial recurrence runs once per core (nb=1 on v5e/v6e; nb=2 on v4/v5p/v7x,
    # split across cores by dimension_semantics=("parallel",)).
    nb = _tensorcores_per_pallas_grid()
    if B % nb != 0:
        nb = 1
    Bb = B // nb

    # Layout plumbing only (done by XLA, outside the kernel): per-batch-block time-major ids of
    # shape (nb, T*Bb, 1) so per-timestep rows are contiguous & sublane-aligned in-kernel.
    ids_tm = ids.reshape(nb, Bb, T).transpose(0, 2, 1).reshape(nb, T * Bb, 1).astype(jnp.int32)

    def full(arr):  # whole-array block, grid-invariant (same block index every grid step)
        return pl.BlockSpec(arr.shape, lambda i, _nd=arr.ndim: (0,) * _nd)

    grid_spec = pltpu.PrefetchScalarGridSpec(
        num_scalar_prefetch=0,
        grid=(nb,),
        in_specs=[
            pl.BlockSpec((1, T * Bb, 1), lambda i: (i, 0, 0)),   # token ids (time-major block)
            full(params["gtab_f"]), full(params["gtab_b"]),
            full(params["whh_f"]),
            full(params["wlin_f"]), full(params["wlin_b"]), full(params["blin"]),
        ],
        out_specs=pl.BlockSpec((Bb, C), lambda i: (i, 0)),
        scratch_shapes=[pltpu.VMEM((T * Bb, 4 * H), jnp.float32)],   # precomputed input gates
    )
    return pl.pallas_call(
        rnn_kernel,
        out_shape=jax.ShapeDtypeStruct((B, C), jnp.float32),
        grid_spec=grid_spec,
        compiler_params=pltpu.CompilerParams(
            dimension_semantics=("parallel",)),   # megacore chips: blocks split across TCs
    )(ids_tm, params["gtab_f"], params["gtab_b"], params["whh_f"],
      params["wlin_f"], params["wlin_b"], params["blin"])


def init_params(key):
    ks = jax.random.split(key, 12)
    V, D, H, C = VOCAB_SIZE, EMBED_DIM, HIDDEN_SIZE, NUM_TAGS
    s = 0.1
    bf = jnp.bfloat16
    emb = jax.random.normal(ks[0], (V, D), jnp.float32) / jnp.sqrt(V)
    # PyTorch LSTM params: weight_ih (4H, D), weight_hh (4H, H), biases (4H,), gate order i,f,g,o.
    w_ih_f = s * jax.random.normal(ks[1], (4 * H, D), jnp.float32)
    w_hh_f = s * jax.random.normal(ks[2], (4 * H, H), jnp.float32)
    b_f = (s * jax.random.normal(ks[3], (4 * H,), jnp.float32)       # bias_ih_f
           + s * jax.random.normal(ks[4], (4 * H,), jnp.float32))    # + bias_hh_f
    w_ih_b = s * jax.random.normal(ks[5], (4 * H, D), jnp.float32)
    # NOTE: weight_hh of the reverse direction exists in the PyTorch module but out[:, -1, :]
    # never depends on it (reverse scan's last-position hidden uses only x_{T-1} and zero state),
    # so it is never materialized for the kernel.
    b_b = (s * jax.random.normal(ks[7], (4 * H,), jnp.float32)       # bias_ih_b
           + s * jax.random.normal(ks[8], (4 * H,), jnp.float32))    # + bias_hh_b
    w_lin = s * jax.random.normal(ks[9], (C, 2 * H), jnp.float32)
    b_lin = s * jax.random.normal(ks[10], (C,), jnp.float32)

    # Algebraic fusion (review item): Embedding followed by x @ W_ih^T + b is exactly a row
    # gather of (emb @ W_ih^T + b), so build the fused (V, 4H) gate tables once outside the
    # kernel. Removes one hoisted MXU op and the x_all intermediate from the kernel.
    gtab_f = (emb @ w_ih_f.T + b_f).astype(bf)                       # (V, 4H)
    gtab_b = (emb @ w_ih_b.T + b_b).astype(bf)                       # (V, 4H)

    return {
        "gtab_f": gtab_f, "gtab_b": gtab_b,
        "whh_f": w_hh_f.T.astype(bf),                                # (H, 4H)
        "wlin_f": w_lin[:, :H].T.astype(bf),                         # (H, C)
        "wlin_b": w_lin[:, H:].T.astype(bf),                         # (H, C)
        "blin": b_lin.reshape(1, C),
    }


def reference_forward(ids, params):
    """Pure-JAX reference with the same bf16-table / f32-accumulate math as the kernel."""
    B, T = ids.shape
    H = HIDDEN_SIZE
    bf = jnp.bfloat16

    gin = params["gtab_f"][ids].astype(jnp.float32)                  # (B, T, 4H) row gather
    h, c = _lstm_cell(gin[:, 0, :], jnp.zeros((B, H), jnp.float32), H)
    for t in range(1, T):
        gates = gin[:, t, :] + jnp.dot(h.astype(bf), params["whh_f"],
                                       preferred_element_type=jnp.float32)
        h, c = _lstm_cell(gates, c, H)

    g_b = params["gtab_b"][ids[:, -1]].astype(jnp.float32)
    hb, _ = _lstm_cell(g_b, jnp.zeros((B, H), jnp.float32), H)

    logits = (jnp.dot(h.astype(bf), params["wlin_f"], preferred_element_type=jnp.float32)
              + jnp.dot(hb.astype(bf), params["wlin_b"], preferred_element_type=jnp.float32)
              + params["blin"])
    return jax.nn.log_softmax(logits, axis=-1)


if __name__ == "__main__":
    key = jax.random.PRNGKey(0)
    k_ids, k_par = jax.random.split(key)
    ids = jax.random.randint(k_ids, (BATCH, SEQ_LEN), 0, VOCAB_SIZE, dtype=jnp.int32)
    params = init_params(k_par)

    out = jax.block_until_ready(rnn_forward(ids, params))
    ref = jax.block_until_ready(reference_forward(ids, params))

    assert out.shape == (BATCH, NUM_TAGS)
    assert bool(jnp.allclose(out, ref, atol=5e-3, rtol=5e-3)), "mismatch vs JAX reference"
    print("KERNEL_OK")
</pallas_src>

<mosaic_0001>
module attributes {stable_mosaic.version = 11 : i64} {
  func.func @rnn_kernel(%arg0: i32, %arg1: memref<1x128x1xi32, #tpu.memory_space<vmem>>, %arg2: memref<32x512xbf16, #tpu.memory_space<vmem>>, %arg3: memref<32x512xbf16, #tpu.memory_space<vmem>>, %arg4: memref<128x512xbf16, #tpu.memory_space<vmem>>, %arg5: memref<128x8xbf16, #tpu.memory_space<vmem>>, %arg6: memref<128x8xbf16, #tpu.memory_space<vmem>>, %arg7: memref<1x8xf32, #tpu.memory_space<vmem>>, %arg8: memref<16x8xf32, #tpu.memory_space<vmem>>, %arg9: memref<128x512xf32, #tpu.memory_space<vmem>>) attributes {dimension_semantics = [#tpu.dimension_semantics<parallel>], iteration_bounds = array<i64: 1>, scalar_prefetch = 0 : i64, scratch_operands = 1 : i64, tpu.core_type = #tpu.core_type<tc>, window_params = [{transform_indices = @transform_0, window_bounds = array<i64: 1, 128, 1>}, {pipeline_mode = #tpu.pipeline_mode<synchronous>, transform_indices = @transform_1, window_bounds = array<i64: 32, 512>}, {pipeline_mode = #tpu.pipeline_mode<synchronous>, transform_indices = @transform_2, window_bounds = array<i64: 32, 512>}, {pipeline_mode = #tpu.pipeline_mode<synchronous>, transform_indices = @transform_3, window_bounds = array<i64: 128, 512>}, {pipeline_mode = #tpu.pipeline_mode<synchronous>, transform_indices = @transform_4, window_bounds = array<i64: 128, 8>}, {pipeline_mode = #tpu.pipeline_mode<synchronous>, transform_indices = @transform_5, window_bounds = array<i64: 128, 8>}, {pipeline_mode = #tpu.pipeline_mode<synchronous>, transform_indices = @transform_6, window_bounds = array<i64: 1, 8>}, {transform_indices = @transform_7, window_bounds = array<i64: 16, 8>}]} {
    %c0 = arith.constant 0 : index
    %c0_0 = arith.constant 0 : index
    %c0_1 = arith.constant 0 : index
    %0 = vector.load %arg1[%c0, %c0_0, %c0_1] : memref<1x128x1xi32, #tpu.memory_space<vmem>>, vector<1x128x1xi32>
    %1 = vector.shape_cast %0 : vector<1x128x1xi32> to vector<128x1xi32>
    %2 = tpu.iota {dimensions = array<i32: 1>} : vector<128x32xi32>
    %3 = vector.broadcast %1 : vector<128x1xi32> to vector<128x32xi32>
    %4 = arith.cmpi eq, %3, %2 : vector<128x32xi32>
    %5 = arith.extui %4 : vector<128x32xi1> to vector<128x32xi32>
    %6 = arith.sitofp %5 : vector<128x32xi32> to vector<128x32xf32>
    %7 = arith.truncf %6 : vector<128x32xf32> to vector<128x32xbf16>
    %c0_2 = arith.constant 0 : index
    %c0_3 = arith.constant 0 : index
    %8 = vector.load %arg2[%c0_2, %c0_3] : memref<32x512xbf16, #tpu.memory_space<vmem>>, vector<32x512xbf16>
    %cst = arith.constant dense<0.000000e+00> : vector<128x512xf32>
    %9 = tpu.matmul %7, %8, %cst {dimension_numbers = #tpu.dot_dimension_numbers<[1], [0], [0], [1], [0, 0, 1, 1], [], []>} : vector<128x32xbf16>, vector<32x512xbf16>, vector<128x512xf32> -> vector<128x512xf32>
    %c0_4 = arith.constant 0 : index
    %c0_5 = arith.constant 0 : index
    %10 = vector.load %arg9[%c0_4, %c0_5] : memref<128x512xf32, #tpu.memory_space<vmem>>, vector<128x512xf32>
    tpu.vector_store %arg9[%c0_4, %c0_5], %9 {strides = array<i32>} : memref<128x512xf32, #tpu.memory_space<vmem>>, vector<128x512xf32>,
    %11 = vector.extract_strided_slice %7 {offsets = [112, 0], sizes = [16, 32], strides = [1, 1]} : vector<128x32xbf16> to vector<16x32xbf16>
    %c0_6 = arith.constant 0 : index
    %c0_7 = arith.constant 0 : index
    %12 = vector.load %arg3[%c0_6, %c0_7] : memref<32x512xbf16, #tpu.memory_space<vmem>>, vector<32x512xbf16>
    %cst_8 = arith.constant dense<0.000000e+00> : vector<16x512xf32>
    %13 = tpu.matmul %11, %12, %cst_8 {dimension_numbers = #tpu.dot_dimension_numbers<[1], [0], [0], [1], [0, 0, 1, 1], [], []>} : vector<16x32xbf16>, vector<32x512xbf16>, vector<16x512xf32> -> vector<16x512xf32>
    %c0_9 = arith.constant 0 : index
    %c0_10 = arith.constant 0 : index
    %14 = vector.load %arg4[%c0_9, %c0_10] : memref<128x512xbf16, #tpu.memory_space<vmem>>, vector<128x512xbf16>
    %c0_11 = arith.constant 0 : index
    %c0_12 = arith.constant 0 : index
    %15 = vector.load %arg9[%c0_11, %c0_12] : memref<128x512xf32, #tpu.memory_space<vmem>>, vector<16x512xf32>
    %cst_13 = arith.constant 0.000000e+00 : f32
    %16 = vector.broadcast %cst_13 : f32 to vector<16x128xf32>
    %17 = vector.extract_strided_slice %15 {offsets = [0, 0], sizes = [16, 128], strides = [1, 1]} : vector<16x512xf32> to vector<16x128xf32>
    %cst_14 = arith.constant 5.000000e-01 : f32
    %18 = vector.broadcast %cst_14 : f32 to vector<16x128xf32>
    %19 = arith.mulf %18, %17 : vector<16x128xf32>
    %20 = math.tanh %19 : vector<16x128xf32>
    %cst_15 = arith.constant 1.000000e+00 : f32
    %21 = vector.broadcast %cst_15 : f32 to vector<16x128xf32>
    %22 = arith.addf %20, %21 : vector<16x128xf32>
    %cst_16 = arith.constant 5.000000e-01 : f32
    %23 = vector.broadcast %cst_16 : f32 to vector<16x128xf32>
    %24 = arith.mulf %23, %22 : vector<16x128xf32>
    %25 = vector.extract_strided_slice %15 {offsets = [0, 128], sizes = [16, 128], strides = [1, 1]} : vector<16x512xf32> to vector<16x128xf32>
    %cst_17 = arith.constant 5.000000e-01 : f32
    %26 = vector.broadcast %cst_17 : f32 to vector<16x128xf32>
    %27 = arith.mulf %26, %25 : vector<16x128xf32>
    %28 = math.tanh %27 : vector<16x128xf32>
    %cst_18 = arith.constant 1.000000e+00 : f32
    %29 = vector.broadcast %cst_18 : f32 to vector<16x128xf32>
    %30 = arith.addf %28, %29 : vector<16x128xf32>
    %cst_19 = arith.constant 5.000000e-01 : f32
    %31 = vector.broadcast %cst_19 : f32 to vector<16x128xf32>
    %32 = arith.mulf %31, %30 : vector<16x128xf32>
    %33 = vector.extract_strided_slice %15 {offsets = [0, 256], sizes = [16, 128], strides = [1, 1]} : vector<16x512xf32> to vector<16x128xf32>
    %34 = math.tanh %33 : vector<16x128xf32>
    %35 = vector.extract_strided_slice %15 {offsets = [0, 384], sizes = [16, 128], strides = [1, 1]} : vector<16x512xf32> to vector<16x128xf32>
    %cst_20 = arith.constant 5.000000e-01 : f32
    %36 = vector.broadcast %cst_20 : f32 to vector<16x128xf32>
    %37 = arith.mulf %36, %35 : vector<16x128xf32>
    %38 = math.tanh %37 : vector<16x128xf32>
    %cst_21 = arith.constant 1.000000e+00 : f32
    %39 = vector.broadcast %cst_21 : f32 to vector<16x128xf32>
    %40 = arith.addf %38, %39 : vector<16x128xf32>
    %cst_22 = arith.constant 5.000000e-01 : f32
    %41 = vector.broadcast %cst_22 : f32 to vector<16x128xf32>
    %42 = arith.mulf %41, %40 : vector<16x128xf32>
    %43 = arith.mulf %32, %16 : vector<16x128xf32>
    %44 = arith.mulf %24, %34 : vector<16x128xf32>
    %45 = arith.addf %43, %44 : vector<16x128xf32>
    %46 = math.tanh %45 : vector<16x128xf32>
    %47 = arith.mulf %42, %46 : vector<16x128xf32>
    %c1_i32 = arith.constant 1 : i32
    %c16_i32 = arith.constant 16 : i32
    %48 = arith.muli %c1_i32, %c16_i32 : i32
    %49 = tpu.assume_multiple %48, 16 : i32
    %50 = arith.index_cast %49 : i32 to index
    %c0_23 = arith.constant 0 : index
    %51 = vector.load %arg9[%50, %c0_23] : memref<128x512xf32, #tpu.memory_space<vmem>>, vector<16x512xf32>
    %52 = arith.truncf %47 : vector<16x128xf32> to vector<16x128xbf16>
    %cst_24 = arith.constant dense<0.000000e+00> : vector<16x512xf32>
    %53 = tpu.matmul %52, %14, %cst_24 {dimension_numbers = #tpu.dot_dimension_numbers<[1], [0], [0], [1], [0, 0, 1, 1], [], []>} : vector<16x128xbf16>, vector<128x512xbf16>, vector<16x512xf32> -> vector<16x512xf32>
    %54 = arith.addf %51, %53 : vector<16x512xf32>
    %55 = vector.extract_strided_slice %54 {offsets = [0, 0], sizes = [16, 128], strides = [1, 1]} : vector<16x512xf32> to vector<16x128xf32>
    %cst_25 = arith.constant 5.000000e-01 : f32
    %56 = vector.broadcast %cst_25 : f32 to vector<16x128xf32>
    %57 = arith.mulf %56, %55 : vector<16x128xf32>
    %58 = math.tanh %57 : vector<16x128xf32>
    %cst_26 = arith.constant 1.000000e+00 : f32
    %59 = vector.broadcast %cst_26 : f32 to vector<16x128xf32>
    %60 = arith.addf %58, %59 : vector<16x128xf32>
    %cst_27 = arith.constant 5.000000e-01 : f32
    %61 = vector.broadcast %cst_27 : f32 to vector<16x128xf32>
    %62 = arith.mulf %61, %60 : vector<16x128xf32>
    %63 = vector.extract_strided_slice %54 {offsets = [0, 128], sizes = [16, 128], strides = [1, 1]} : vector<16x512xf32> to vector<16x128xf32>
    %cst_28 = arith.constant 5.000000e-01 : f32
    %64 = vector.broadcast %cst_28 : f32 to vector<16x128xf32>
    %65 = arith.mulf %64, %63 : vector<16x128xf32>
    %66 = math.tanh %65 : vector<16x128xf32>
    %cst_29 = arith.constant 1.000000e+00 : f32
    %67 = vector.broadcast %cst_29 : f32 to vector<16x128xf32>
    %68 = arith.addf %66, %67 : vector<16x128xf32>
    %cst_30 = arith.constant 5.000000e-01 : f32
    %69 = vector.broadcast %cst_30 : f32 to vector<16x128xf32>
    %70 = arith.mulf %69, %68 : vector<16x128xf32>
    %71 = vector.extract_strided_slice %54 {offsets = [0, 256], sizes = [16, 128], strides = [1, 1]} : vector<16x512xf32> to vector<16x128xf32>
    %72 = math.tanh %71 : vector<16x128xf32>
    %73 = vector.extract_strided_slice %54 {offsets = [0, 384], sizes = [16, 128], strides = [1, 1]} : vector<16x512xf32> to vector<16x128xf32>
    %cst_31 = arith.constant 5.000000e-01 : f32
    %74 = vector.broadcast %cst_31 : f32 to vector<16x128xf32>
    %75 = arith.mulf %74, %73 : vector<16x128xf32>
    %76 = math.tanh %75 : vector<16x128xf32>
    %cst_32 = arith.constant 1.000000e+00 : f32
    %77 = vector.broadcast %cst_32 : f32 to vector<16x128xf32>
    %78 = arith.addf %76, %77 : vector<16x128xf32>
    %cst_33 = arith.constant 5.000000e-01 : f32
    %79 = vector.broadcast %cst_33 : f32 to vector<16x128xf32>
    %80 = arith.mulf %79, %78 : vector<16x128xf32>
    %81 = arith.mulf %70, %45 : vector<16x128xf32>
    %82 = arith.mulf %62, %72 : vector<16x128xf32>
    %83 = arith.addf %81, %82 : vector<16x128xf32>
    %84 = math.tanh %83 : vector<16x128xf32>
    %85 = arith.mulf %80, %84 : vector<16x128xf32>
    %c2_i32 = arith.constant 2 : i32
    %c16_i32_34 = arith.constant 16 : i32
    %86 = arith.muli %c2_i32, %c16_i32_34 : i32
    %87 = tpu.assume_multiple %86, 16 : i32
    %88 = arith.index_cast %87 : i32 to index
    %c0_35 = arith.constant 0 : index
    %89 = vector.load %arg9[%88, %c0_35] : memref<128x512xf32, #tpu.memory_space<vmem>>, vector<16x512xf32>
    %90 = arith.truncf %85 : vector<16x128xf32> to vector<16x128xbf16>
    %cst_36 = arith.constant dense<0.000000e+00> : vector<16x512xf32>
    %91 = tpu.matmul %90, %14, %cst_36 {dimension_numbers = #tpu.dot_dimension_numbers<[1], [0], [0], [1], [0, 0, 1, 1], [], []>} : vector<16x128xbf16>, vector<128x512xbf16>, vector<16x512xf32> -> vector<16x512xf32>
    %92 = arith.addf %89, %91 : vector<16x512xf32>
    %93 = vector.extract_strided_slice %92 {offsets = [0, 0], sizes = [16, 128], strides = [1, 1]} : vector<16x512xf32> to vector<16x128xf32>
    %cst_37 = arith.constant 5.000000e-01 : f32
    %94 = vector.broadcast %cst_37 : f32 to vector<16x128xf32>
    %95 = arith.mulf %94, %93 : vector<16x128xf32>
    %96 = math.tanh %95 : vector<16x128xf32>
    %cst_38 = arith.constant 1.000000e+00 : f32
    %97 = vector.broadcast %cst_38 : f32 to vector<16x128xf32>
    %98 = arith.addf %96, %97 : vector<16x128xf32>
    %cst_39 = arith.constant 5.000000e-01 : f32
    %99 = vector.broadcast %cst_39 : f32 to vector<16x128xf32>
    %100 = arith.mulf %99, %98 : vector<16x128xf32>
    %101 = vector.extract_strided_slice %92 {offsets = [0, 128], sizes = [16, 128], strides = [1, 1]} : vector<16x512xf32> to vector<16x128xf32>
    %cst_40 = arith.constant 5.000000e-01 : f32
    %102 = vector.broadcast %cst_40 : f32 to vector<16x128xf32>
    %103 = arith.mulf %102, %101 : vector<16x128xf32>
    %104 = math.tanh %103 : vector<16x128xf32>
    %cst_41 = arith.constant 1.000000e+00 : f32
    %105 = vector.broadcast %cst_41 : f32 to vector<16x128xf32>
    %106 = arith.addf %104, %105 : vector<16x128xf32>
    %cst_42 = arith.constant 5.000000e-01 : f32
    %107 = vector.broadcast %cst_42 : f32 to vector<16x128xf32>
    %108 = arith.mulf %107, %106 : vector<16x128xf32>
    %109 = vector.extract_strided_slice %92 {offsets = [0, 256], sizes = [16, 128], strides = [1, 1]} : vector<16x512xf32> to vector<16x128xf32>
    %110 = math.tanh %109 : vector<16x128xf32>
    %111 = vector.extract_strided_slice %92 {offsets = [0, 384], sizes = [16, 128], strides = [1, 1]} : vector<16x512xf32> to vector<16x128xf32>
    %cst_43 = arith.constant 5.000000e-01 : f32
    %112 = vector.broadcast %cst_43 : f32 to vector<16x128xf32>
    %113 = arith.mulf %112, %111 : vector<16x128xf32>
    %114 = math.tanh %113 : vector<16x128xf32>
    %cst_44 = arith.constant 1.000000e+00 : f32
    %115 = vector.broadcast %cst_44 : f32 to vector<16x128xf32>
    %116 = arith.addf %114, %115 : vector<16x128xf32>
    %cst_45 = arith.constant 5.000000e-01 : f32
    %117 = vector.broadcast %cst_45 : f32 to vector<16x128xf32>
    %118 = arith.mulf %117, %116 : vector<16x128xf32>
    %119 = arith.mulf %108, %83 : vector<16x128xf32>
    %120 = arith.mulf %100, %110 : vector<16x128xf32>
    %121 = arith.addf %119, %120 : vector<16x128xf32>
    %122 = math.tanh %121 : vector<16x128xf32>
    %123 = arith.mulf %118, %122 : vector<16x128xf32>
    %c3_i32 = arith.constant 3 : i32
    %c16_i32_46 = arith.constant 16 : i32
    %124 = arith.muli %c3_i32, %c16_i32_46 : i32
    %125 = tpu.assume_multiple %124, 16 : i32
    %126 = arith.index_cast %125 : i32 to index
    %c0_47 = arith.constant 0 : index
    %127 = vector.load %arg9[%126, %c0_47] : memref<128x512xf32, #tpu.memory_space<vmem>>, vector<16x512xf32>
    %128 = arith.truncf %123 : vector<16x128xf32> to vector<16x128xbf16>
    %cst_48 = arith.constant dense<0.000000e+00> : vector<16x512xf32>
    %129 = tpu.matmul %128, %14, %cst_48 {dimension_numbers = #tpu.dot_dimension_numbers<[1], [0], [0], [1], [0, 0, 1, 1], [], []>} : vector<16x128xbf16>, vector<128x512xbf16>, vector<16x512xf32> -> vector<16x512xf32>
    %130 = arith.addf %127, %129 : vector<16x512xf32>
    %131 = vector.extract_strided_slice %130 {offsets = [0, 0], sizes = [16, 128], strides = [1, 1]} : vector<16x512xf32> to vector<16x128xf32>
    %cst_49 = arith.constant 5.000000e-01 : f32
    %132 = vector.broadcast %cst_49 : f32 to vector<16x128xf32>
    %133 = arith.mulf %132, %131 : vector<16x128xf32>
    %134 = math.tanh %133 : vector<16x128xf32>
    %cst_50 = arith.constant 1.000000e+00 : f32
    %135 = vector.broadcast %cst_50 : f32 to vector<16x128xf32>
    %136 = arith.addf %134, %135 : vector<16x128xf32>
    %cst_51 = arith.constant 5.000000e-01 : f32
    %137 = vector.broadcast %cst_51 : f32 to vector<16x128xf32>
    %138 = arith.mulf %137, %136 : vector<16x128xf32>
    %139 = vector.extract_strided_slice %130 {offsets = [0, 128], sizes = [16, 128], strides = [1, 1]} : vector<16x512xf32> to vector<16x128xf32>
    %cst_52 = arith.constant 5.000000e-01 : f32
    %140 = vector.broadcast %cst_52 : f32 to vector<16x128xf32>
    %141 = arith.mulf %140, %139 : vector<16x128xf32>
    %142 = math.tanh %141 : vector<16x128xf32>
    %cst_53 = arith.constant 1.000000e+00 : f32
    %143 = vector.broadcast %cst_53 : f32 to vector<16x128xf32>
    %144 = arith.addf %142, %143 : vector<16x128xf32>
    %cst_54 = arith.constant 5.000000e-01 : f32
    %145 = vector.broadcast %cst_54 : f32 to vector<16x128xf32>
    %146 = arith.mulf %145, %144 : vector<16x128xf32>
    %147 = vector.extract_strided_slice %130 {offsets = [0, 256], sizes = [16, 128], strides = [1, 1]} : vector<16x512xf32> to vector<16x128xf32>
    %148 = math.tanh %147 : vector<16x128xf32>
    %149 = vector.extract_strided_slice %130 {offsets = [0, 384], sizes = [16, 128], strides = [1, 1]} : vector<16x512xf32> to vector<16x128xf32>
    %cst_55 = arith.constant 5.000000e-01 : f32
    %150 = vector.broadcast %cst_55 : f32 to vector<16x128xf32>
    %151 = arith.mulf %150, %149 : vector<16x128xf32>
    %152 = math.tanh %151 : vector<16x128xf32>
    %cst_56 = arith.constant 1.000000e+00 : f32
    %153 = vector.broadcast %cst_56 : f32 to vector<16x128xf32>
    %154 = arith.addf %152, %153 : vector<16x128xf32>
    %cst_57 = arith.constant 5.000000e-01 : f32
    %155 = vector.broadcast %cst_57 : f32 to vector<16x128xf32>
    %156 = arith.mulf %155, %154 : vector<16x128xf32>
    %157 = arith.mulf %146, %121 : vector<16x128xf32>
    %158 = arith.mulf %138, %148 : vector<16x128xf32>
    %159 = arith.addf %157, %158 : vector<16x128xf32>
    %160 = math.tanh %159 : vector<16x128xf32>
    %161 = arith.mulf %156, %160 : vector<16x128xf32>
    %c4_i32 = arith.constant 4 : i32
    %c16_i32_58 = arith.constant 16 : i32
    %162 = arith.muli %c4_i32, %c16_i32_58 : i32
    %163 = tpu.assume_multiple %162, 16 : i32
    %164 = arith.index_cast %163 : i32 to index
    %c0_59 = arith.constant 0 : index
    %165 = vector.load %arg9[%164, %c0_59] : memref<128x512xf32, #tpu.memory_space<vmem>>, vector<16x512xf32>
    %166 = arith.truncf %161 : vector<16x128xf32> to vector<16x128xbf16>
    %cst_60 = arith.constant dense<0.000000e+00> : vector<16x512xf32>
    %167 = tpu.matmul %166, %14, %cst_60 {dimension_numbers = #tpu.dot_dimension_numbers<[1], [0], [0], [1], [0, 0, 1, 1], [], []>} : vector<16x128xbf16>, vector<128x512xbf16>, vector<16x512xf32> -> vector<16x512xf32>
    %168 = arith.addf %165, %167 : vector<16x512xf32>
    %169 = vector.extract_strided_slice %168 {offsets = [0, 0], sizes = [16, 128], strides = [1, 1]} : vector<16x512xf32> to vector<16x128xf32>
    %cst_61 = arith.constant 5.000000e-01 : f32
    %170 = vector.broadcast %cst_61 : f32 to vector<16x128xf32>
    %171 = arith.mulf %170, %169 : vector<16x128xf32>
    %172 = math.tanh %171 : vector<16x128xf32>
    %cst_62 = arith.constant 1.000000e+00 : f32
    %173 = vector.broadcast %cst_62 : f32 to vector<16x128xf32>
    %174 = arith.addf %172, %173 : vector<16x128xf32>
    %cst_63 = arith.constant 5.000000e-01 : f32
    %175 = vector.broadcast %cst_63 : f32 to vector<16x128xf32>
    %176 = arith.mulf %175, %174 : vector<16x128xf32>
    %177 = vector.extract_strided_slice %168 {offsets = [0, 128], sizes = [16, 128], strides = [1, 1]} : vector<16x512xf32> to vector<16x128xf32>
    %cst_64 = arith.constant 5.000000e-01 : f32
    %178 = vector.broadcast %cst_64 : f32 to vector<16x128xf32>
    %179 = arith.mulf %178, %177 : vector<16x128xf32>
    %180 = math.tanh %179 : vector<16x128xf32>
    %cst_65 = arith.constant 1.000000e+00 : f32
    %181 = vector.broadcast %cst_65 : f32 to vector<16x128xf32>
    %182 = arith.addf %180, %181 : vector<16x128xf32>
    %cst_66 = arith.constant 5.000000e-01 : f32
    %183 = vector.broadcast %cst_66 : f32 to vector<16x128xf32>
    %184 = arith.mulf %183, %182 : vector<16x128xf32>
    %185 = vector.extract_strided_slice %168 {offsets = [0, 256], sizes = [16, 128], strides = [1, 1]} : vector<16x512xf32> to vector<16x128xf32>
    %186 = math.tanh %185 : vector<16x128xf32>
    %187 = vector.extract_strided_slice %168 {offsets = [0, 384], sizes = [16, 128], strides = [1, 1]} : vector<16x512xf32> to vector<16x128xf32>
    %cst_67 = arith.constant 5.000000e-01 : f32
    %188 = vector.broadcast %cst_67 : f32 to vector<16x128xf32>
    %189 = arith.mulf %188, %187 : vector<16x128xf32>
    %190 = math.tanh %189 : vector<16x128xf32>
    %cst_68 = arith.constant 1.000000e+00 : f32
    %191 = vector.broadcast %cst_68 : f32 to vector<16x128xf32>
    %192 = arith.addf %190, %191 : vector<16x128xf32>
    %cst_69 = arith.constant 5.000000e-01 : f32
    %193 = vector.broadcast %cst_69 : f32 to vector<16x128xf32>
    %194 = arith.mulf %193, %192 : vector<16x128xf32>
    %195 = arith.mulf %184, %159 : vector<16x128xf32>
    %196 = arith.mulf %176, %186 : vector<16x128xf32>
    %197 = arith.addf %195, %196 : vector<16x128xf32>
    %198 = math.tanh %197 : vector<16x128xf32>
    %199 = arith.mulf %194, %198 : vector<16x128xf32>
    %c5_i32 = arith.constant 5 : i32
    %c16_i32_70 = arith.constant 16 : i32
    %200 = arith.muli %c5_i32, %c16_i32_70 : i32
    %201 = tpu.assume_multiple %200, 16 : i32
    %202 = arith.index_cast %201 : i32 to index
    %c0_71 = arith.constant 0 : index
    %203 = vector.load %arg9[%202, %c0_71] : memref<128x512xf32, #tpu.memory_space<vmem>>, vector<16x512xf32>
    %204 = arith.truncf %199 : vector<16x128xf32> to vector<16x128xbf16>
    %cst_72 = arith.constant dense<0.000000e+00> : vector<16x512xf32>
    %205 = tpu.matmul %204, %14, %cst_72 {dimension_numbers = #tpu.dot_dimension_numbers<[1], [0], [0], [1], [0, 0, 1, 1], [], []>} : vector<16x128xbf16>, vector<128x512xbf16>, vector<16x512xf32> -> vector<16x512xf32>
    %206 = arith.addf %203, %205 : vector<16x512xf32>
    %207 = vector.extract_strided_slice %206 {offsets = [0, 0], sizes = [16, 128], strides = [1, 1]} : vector<16x512xf32> to vector<16x128xf32>
    %cst_73 = arith.constant 5.000000e-01 : f32
    %208 = vector.broadcast %cst_73 : f32 to vector<16x128xf32>
    %209 = arith.mulf %208, %207 : vector<16x128xf32>
    %210 = math.tanh %209 : vector<16x128xf32>
    %cst_74 = arith.constant 1.000000e+00 : f32
    %211 = vector.broadcast %cst_74 : f32 to vector<16x128xf32>
    %212 = arith.addf %210, %211 : vector<16x128xf32>
    %cst_75 = arith.constant 5.000000e-01 : f32
    %213 = vector.broadcast %cst_75 : f32 to vector<16x128xf32>
    %214 = arith.mulf %213, %212 : vector<16x128xf32>
    %215 = vector.extract_strided_slice %206 {offsets = [0, 128], sizes = [16, 128], strides = [1, 1]} : vector<16x512xf32> to vector<16x128xf32>
    %cst_76 = arith.constant 5.000000e-01 : f32
    %216 = vector.broadcast %cst_76 : f32 to vector<16x128xf32>
    %217 = arith.mulf %216, %215 : vector<16x128xf32>
    %218 = math.tanh %217 : vector<16x128xf32>
    %cst_77 = arith.constant 1.000000e+00 : f32
    %219 = vector.broadcast %cst_77 : f32 to vector<16x128xf32>
    %220 = arith.addf %218, %219 : vector<16x128xf32>
    %cst_78 = arith.constant 5.000000e-01 : f32
    %221 = vector.broadcast %cst_78 : f32 to vector<16x128xf32>
    %222 = arith.mulf %221, %220 : vector<16x128xf32>
    %223 = vector.extract_strided_slice %206 {offsets = [0, 256], sizes = [16, 128], strides = [1, 1]} : vector<16x512xf32> to vector<16x128xf32>
    %224 = math.tanh %223 : vector<16x128xf32>
    %225 = vector.extract_strided_slice %206 {offsets = [0, 384], sizes = [16, 128], strides = [1, 1]} : vector<16x512xf32> to vector<16x128xf32>
    %cst_79 = arith.constant 5.000000e-01 : f32
    %226 = vector.broadcast %cst_79 : f32 to vector<16x128xf32>
    %227 = arith.mulf %226, %225 : vector<16x128xf32>
    %228 = math.tanh %227 : vector<16x128xf32>
    %cst_80 = arith.constant 1.000000e+00 : f32
    %229 = vector.broadcast %cst_80 : f32 to vector<16x128xf32>
    %230 = arith.addf %228, %229 : vector<16x128xf32>
    %cst_81 = arith.constant 5.000000e-01 : f32
    %231 = vector.broadcast %cst_81 : f32 to vector<16x128xf32>
    %232 = arith.mulf %231, %230 : vector<16x128xf32>
    %233 = arith.mulf %222, %197 : vector<16x128xf32>
    %234 = arith.mulf %214, %224 : vector<16x128xf32>
    %235 = arith.addf %233, %234 : vector<16x128xf32>
    %236 = math.tanh %235 : vector<16x128xf32>
    %237 = arith.mulf %232, %236 : vector<16x128xf32>
    %c6_i32 = arith.constant 6 : i32
    %c16_i32_82 = arith.constant 16 : i32
    %238 = arith.muli %c6_i32, %c16_i32_82 : i32
    %239 = tpu.assume_multiple %238, 16 : i32
    %240 = arith.index_cast %239 : i32 to index
    %c0_83 = arith.constant 0 : index
    %241 = vector.load %arg9[%240, %c0_83] : memref<128x512xf32, #tpu.memory_space<vmem>>, vector<16x512xf32>
    %242 = arith.truncf %237 : vector<16x128xf32> to vector<16x128xbf16>
    %cst_84 = arith.constant dense<0.000000e+00> : vector<16x512xf32>
    %243 = tpu.matmul %242, %14, %cst_84 {dimension_numbers = #tpu.dot_dimension_numbers<[1], [0], [0], [1], [0, 0, 1, 1], [], []>} : vector<16x128xbf16>, vector<128x512xbf16>, vector<16x512xf32> -> vector<16x512xf32>
    %244 = arith.addf %241, %243 : vector<16x512xf32>
    %245 = vector.extract_strided_slice %244 {offsets = [0, 0], sizes = [16, 128], strides = [1, 1]} : vector<16x512xf32> to vector<16x128xf32>
    %cst_85 = arith.constant 5.000000e-01 : f32
    %246 = vector.broadcast %cst_85 : f32 to vector<16x128xf32>
    %247 = arith.mulf %246, %245 : vector<16x128xf32>
    %248 = math.tanh %247 : vector<16x128xf32>
    %cst_86 = arith.constant 1.000000e+00 : f32
    %249 = vector.broadcast %cst_86 : f32 to vector<16x128xf32>
    %250 = arith.addf %248, %249 : vector<16x128xf32>
    %cst_87 = arith.constant 5.000000e-01 : f32
    %251 = vector.broadcast %cst_87 : f32 to vector<16x128xf32>
    %252 = arith.mulf %251, %250 : vector<16x128xf32>
    %253 = vector.extract_strided_slice %244 {offsets = [0, 128], sizes = [16, 128], strides = [1, 1]} : vector<16x512xf32> to vector<16x128xf32>
    %cst_88 = arith.constant 5.000000e-01 : f32
    %254 = vector.broadcast %cst_88 : f32 to vector<16x128xf32>
    %255 = arith.mulf %254, %253 : vector<16x128xf32>
    %256 = math.tanh %255 : vector<16x128xf32>
    %cst_89 = arith.constant 1.000000e+00 : f32
    %257 = vector.broadcast %cst_89 : f32 to vector<16x128xf32>
    %258 = arith.addf %256, %257 : vector<16x128xf32>
    %cst_90 = arith.constant 5.000000e-01 : f32
    %259 = vector.broadcast %cst_90 : f32 to vector<16x128xf32>
    %260 = arith.mulf %259, %258 : vector<16x128xf32>
    %261 = vector.extract_strided_slice %244 {offsets = [0, 256], sizes = [16, 128], strides = [1, 1]} : vector<16x512xf32> to vector<16x128xf32>
    %262 = math.tanh %261 : vector<16x128xf32>
    %263 = vector.extract_strided_slice %244 {offsets = [0, 384], sizes = [16, 128], strides = [1, 1]} : vector<16x512xf32> to vector<16x128xf32>
    %cst_91 = arith.constant 5.000000e-01 : f32
    %264 = vector.broadcast %cst_91 : f32 to vector<16x128xf32>
    %265 = arith.mulf %264, %263 : vector<16x128xf32>
    %266 = math.tanh %265 : vector<16x128xf32>
    %cst_92 = arith.constant 1.000000e+00 : f32
    %267 = vector.broadcast %cst_92 : f32 to vector<16x128xf32>
    %268 = arith.addf %266, %267 : vector<16x128xf32>
    %cst_93 = arith.constant 5.000000e-01 : f32
    %269 = vector.broadcast %cst_93 : f32 to vector<16x128xf32>
    %270 = arith.mulf %269, %268 : vector<16x128xf32>
    %271 = arith.mulf %260, %235 : vector<16x128xf32>
    %272 = arith.mulf %252, %262 : vector<16x128xf32>
    %273 = arith.addf %271, %272 : vector<16x128xf32>
    %274 = math.tanh %273 : vector<16x128xf32>
    %275 = arith.mulf %270, %274 : vector<16x128xf32>
    %c7_i32 = arith.constant 7 : i32
    %c16_i32_94 = arith.constant 16 : i32
    %276 = arith.muli %c7_i32, %c16_i32_94 : i32
    %277 = tpu.assume_multiple %276, 16 : i32
    %278 = arith.index_cast %277 : i32 to index
    %c0_95 = arith.constant 0 : index
    %279 = vector.load %arg9[%278, %c0_95] : memref<128x512xf32, #tpu.memory_space<vmem>>, vector<16x512xf32>
    %280 = arith.truncf %275 : vector<16x128xf32> to vector<16x128xbf16>
    %cst_96 = arith.constant dense<0.000000e+00> : vector<16x512xf32>
    %281 = tpu.matmul %280, %14, %cst_96 {dimension_numbers = #tpu.dot_dimension_numbers<[1], [0], [0], [1], [0, 0, 1, 1], [], []>} : vector<16x128xbf16>, vector<128x512xbf16>, vector<16x512xf32> -> vector<16x512xf32>
    %282 = arith.addf %279, %281 : vector<16x512xf32>
    %283 = vector.extract_strided_slice %282 {offsets = [0, 0], sizes = [16, 128], strides = [1, 1]} : vector<16x512xf32> to vector<16x128xf32>
    %cst_97 = arith.constant 5.000000e-01 : f32
    %284 = vector.broadcast %cst_97 : f32 to vector<16x128xf32>
    %285 = arith.mulf %284, %283 : vector<16x128xf32>
    %286 = math.tanh %285 : vector<16x128xf32>
    %cst_98 = arith.constant 1.000000e+00 : f32
    %287 = vector.broadcast %cst_98 : f32 to vector<16x128xf32>
    %288 = arith.addf %286, %287 : vector<16x128xf32>
    %cst_99 = arith.constant 5.000000e-01 : f32
    %289 = vector.broadcast %cst_99 : f32 to vector<16x128xf32>
    %290 = arith.mulf %289, %288 : vector<16x128xf32>
    %291 = vector.extract_strided_slice %282 {offsets = [0, 128], sizes = [16, 128], strides = [1, 1]} : vector<16x512xf32> to vector<16x128xf32>
    %cst_100 = arith.constant 5.000000e-01 : f32
    %292 = vector.broadcast %cst_100 : f32 to vector<16x128xf32>
    %293 = arith.mulf %292, %291 : vector<16x128xf32>
    %294 = math.tanh %293 : vector<16x128xf32>
    %cst_101 = arith.constant 1.000000e+00 : f32
    %295 = vector.broadcast %cst_101 : f32 to vector<16x128xf32>
    %296 = arith.addf %294, %295 : vector<16x128xf32>
    %cst_102 = arith.constant 5.000000e-01 : f32
    %297 = vector.broadcast %cst_102 : f32 to vector<16x128xf32>
    %298 = arith.mulf %297, %296 : vector<16x128xf32>
    %299 = vector.extract_strided_slice %282 {offsets = [0, 256], sizes = [16, 128], strides = [1, 1]} : vector<16x512xf32> to vector<16x128xf32>
    %300 = math.tanh %299 : vector<16x128xf32>
    %301 = vector.extract_strided_slice %282 {offsets = [0, 384], sizes = [16, 128], strides = [1, 1]} : vector<16x512xf32> to vector<16x128xf32>
    %cst_103 = arith.constant 5.000000e-01 : f32
    %302 = vector.broadcast %cst_103 : f32 to vector<16x128xf32>
    %303 = arith.mulf %302, %301 : vector<16x128xf32>
    %304 = math.tanh %303 : vector<16x128xf32>
    %cst_104 = arith.constant 1.000000e+00 : f32
    %305 = vector.broadcast %cst_104 : f32 to vector<16x128xf32>
    %306 = arith.addf %304, %305 : vector<16x128xf32>
    %cst_105 = arith.constant 5.000000e-01 : f32
    %307 = vector.broadcast %cst_105 : f32 to vector<16x128xf32>
    %308 = arith.mulf %307, %306 : vector<16x128xf32>
    %309 = arith.mulf %298, %273 : vector<16x128xf32>
    %310 = arith.mulf %290, %300 : vector<16x128xf32>
    %311 = arith.addf %309, %310 : vector<16x128xf32>
    %312 = math.tanh %311 : vector<16x128xf32>
    %313 = arith.mulf %308, %312 : vector<16x128xf32>
    %c7_i32_106 = arith.constant 7 : i32
    %cst_107 = arith.constant 0.000000e+00 : f32
    %314 = vector.broadcast %cst_107 : f32 to vector<16x128xf32>
    %315 = vector.extract_strided_slice %13 {offsets = [0, 0], sizes = [16, 128], strides = [1, 1]} : vector<16x512xf32> to vector<16x128xf32>
    %cst_108 = arith.constant 5.000000e-01 : f32
    %316 = vector.broadcast %cst_108 : f32 to vector<16x128xf32>
    %317 = arith.mulf %316, %315 : vector<16x128xf32>
    %318 = math.tanh %317 : vector<16x128xf32>
    %cst_109 = arith.constant 1.000000e+00 : f32
    %319 = vector.broadcast %cst_109 : f32 to vector<16x128xf32>
    %320 = arith.addf %318, %319 : vector<16x128xf32>
    %cst_110 = arith.constant 5.000000e-01 : f32
    %321 = vector.broadcast %cst_110 : f32 to vector<16x128xf32>
    %322 = arith.mulf %321, %320 : vector<16x128xf32>
    %323 = vector.extract_strided_slice %13 {offsets = [0, 128], sizes = [16, 128], strides = [1, 1]} : vector<16x512xf32> to vector<16x128xf32>
    %cst_111 = arith.constant 5.000000e-01 : f32
    %324 = vector.broadcast %cst_111 : f32 to vector<16x128xf32>
    %325 = arith.mulf %324, %323 : vector<16x128xf32>
    %326 = math.tanh %325 : vector<16x128xf32>
    %cst_112 = arith.constant 1.000000e+00 : f32
    %327 = vector.broadcast %cst_112 : f32 to vector<16x128xf32>
    %328 = arith.addf %326, %327 : vector<16x128xf32>
    %cst_113 = arith.constant 5.000000e-01 : f32
    %329 = vector.broadcast %cst_113 : f32 to vector<16x128xf32>
    %330 = arith.mulf %329, %328 : vector<16x128xf32>
    %331 = vector.extract_strided_slice %13 {offsets = [0, 256], sizes = [16, 128], strides = [1, 1]} : vector<16x512xf32> to vector<16x128xf32>
    %332 = math.tanh %331 : vector<16x128xf32>
    %333 = vector.extract_strided_slice %13 {offsets = [0, 384], sizes = [16, 128], strides = [1, 1]} : vector<16x512xf32> to vector<16x128xf32>
    %cst_114 = arith.constant 5.000000e-01 : f32
    %334 = vector.broadcast %cst_114 : f32 to vector<16x128xf32>
    %335 = arith.mulf %334, %333 : vector<16x128xf32>
    %336 = math.tanh %335 : vector<16x128xf32>
    %cst_115 = arith.constant 1.000000e+00 : f32
    %337 = vector.broadcast %cst_115 : f32 to vector<16x128xf32>
    %338 = arith.addf %336, %337 : vector<16x128xf32>
    %cst_116 = arith.constant 5.000000e-01 : f32
    %339 = vector.broadcast %cst_116 : f32 to vector<16x128xf32>
    %340 = arith.mulf %339, %338 : vector<16x128xf32>
    %341 = arith.mulf %330, %314 : vector<16x128xf32>
    %342 = arith.mulf %322, %332 : vector<16x128xf32>
    %343 = arith.addf %341, %342 : vector<16x128xf32>
    %344 = math.tanh %343 : vector<16x128xf32>
    %345 = arith.mulf %340, %344 : vector<16x128xf32>
    %346 = arith.truncf %313 : vector<16x128xf32> to vector<16x128xbf16>
    %c0_117 = arith.constant 0 : index
    %c0_118 = arith.constant 0 : index
    %347 = vector.load %arg5[%c0_117, %c0_118] : memref<128x8xbf16, #tpu.memory_space<vmem>>, vector<128x8xbf16>
    %cst_119 = arith.constant dense<0.000000e+00> : vector<16x8xf32>
    %348 = tpu.matmul %346, %347, %cst_119 {dimension_numbers = #tpu.dot_dimension_numbers<[1], [0], [0], [1], [0, 0, 1, 1], [], []>} : vector<16x128xbf16>, vector<128x8xbf16>, vector<16x8xf32> -> vector<16x8xf32>
    %349 = arith.truncf %345 : vector<16x128xf32> to vector<16x128xbf16>
    %c0_120 = arith.constant 0 : index
    %c0_121 = arith.constant 0 : index
    %350 = vector.load %arg6[%c0_120, %c0_121] : memref<128x8xbf16, #tpu.memory_space<vmem>>, vector<128x8xbf16>
    %cst_122 = arith.constant dense<0.000000e+00> : vector<16x8xf32>
    %351 = tpu.matmul %349, %350, %cst_122 {dimension_numbers = #tpu.dot_dimension_numbers<[1], [0], [0], [1], [0, 0, 1, 1], [], []>} : vector<16x128xbf16>, vector<128x8xbf16>, vector<16x8xf32> -> vector<16x8xf32>
    %352 = arith.addf %348, %351 : vector<16x8xf32>
    %c0_123 = arith.constant 0 : index
    %c0_124 = arith.constant 0 : index
    %353 = vector.load %arg7[%c0_123, %c0_124] : memref<1x8xf32, #tpu.memory_space<vmem>>, vector<1x8xf32>
    %354 = vector.broadcast %353 : vector<1x8xf32> to vector<16x8xf32>
    %355 = arith.addf %352, %354 : vector<16x8xf32>
    %cst_125 = arith.constant dense<0xFF800000> : vector<16xf32>
    %356 = vector.multi_reduction <maximumf>, %355, %cst_125 [1] : vector<16x8xf32> to vector<16xf32>
    %357 = vector.shape_cast %356 : vector<16xf32> to vector<16x1xf32>
    %358 = vector.broadcast %357 : vector<16x1xf32> to vector<16x8xf32>
    %359 = arith.subf %355, %358 : vector<16x8xf32>
    %360 = math.exp %359 : vector<16x8xf32>
    %cst_126 = arith.constant dense<0.000000e+00> : vector<16xf32>
    %361 = vector.multi_reduction <add>, %360, %cst_126 [1] : vector<16x8xf32> to vector<16xf32>
    %362 = vector.shape_cast %361 : vector<16xf32> to vector<16x1xf32>
    %363 = math.log %362 : vector<16x1xf32>
    %364 = vector.broadcast %363 : vector<16x1xf32> to vector<16x8xf32>
    %365 = arith.subf %359, %364 : vector<16x8xf32>
    %c0_127 = arith.constant 0 : index
    %c0_128 = arith.constant 0 : index
    %366 = vector.load %arg8[%c0_127, %c0_128] : memref<16x8xf32, #tpu.memory_space<vmem>>, vector<16x8xf32>
    tpu.vector_store %arg8[%c0_127, %c0_128], %365 {strides = array<i32>} : memref<16x8xf32, #tpu.memory_space<vmem>>, vector<16x8xf32>,
    return
  }
  func.func @transform_0(%arg0: i32) -> (i32, i32, i32) {
    %c0_i32 = arith.constant 0 : i32
    %c0_i32_0 = arith.constant 0 : i32
    %c0_i32_1 = arith.constant 0 : i32
    return %arg0, %c0_i32, %c0_i32_0 : i32, i32, i32
  }
  func.func @transform_1(%arg0: i32) -> (i32, i32) {
    %c0_i32 = arith.constant 0 : i32
    %c0_i32_0 = arith.constant 0 : i32
    %c0_i32_1 = arith.constant 0 : i32
    return %c0_i32, %c0_i32_0 : i32, i32
  }
  func.func @transform_2(%arg0: i32) -> (i32, i32) {
    %c0_i32 = arith.constant 0 : i32
    %c0_i32_0 = arith.constant 0 : i32
    %c0_i32_1 = arith.constant 0 : i32
    return %c0_i32, %c0_i32_0 : i32, i32
  }
  func.func @transform_3(%arg0: i32) -> (i32, i32) {
    %c0_i32 = arith.constant 0 : i32
    %c0_i32_0 = arith.constant 0 : i32
    %c0_i32_1 = arith.constant 0 : i32
    return %c0_i32, %c0_i32_0 : i32, i32
  }
  func.func @transform_4(%arg0: i32) -> (i32, i32) {
    %c0_i32 = arith.constant 0 : i32
    %c0_i32_0 = arith.constant 0 : i32
    %c0_i32_1 = arith.constant 0 : i32
    return %c0_i32, %c0_i32_0 : i32, i32
  }
  func.func @transform_5(%arg0: i32) -> (i32, i32) {
    %c0_i32 = arith.constant 0 : i32
    %c0_i32_0 = arith.constant 0 : i32
    %c0_i32_1 = arith.constant 0 : i32
    return %c0_i32, %c0_i32_0 : i32, i32
  }
  func.func @transform_6(%arg0: i32) -> (i32, i32) {
    %c0_i32 = arith.constant 0 : i32
    %c0_i32_0 = arith.constant 0 : i32
    %c0_i32_1 = arith.constant 0 : i32
    return %c0_i32, %c0_i32_0 : i32, i32
  }
  func.func @transform_7(%arg0: i32) -> (i32, i32) {
    %c0_i32 = arith.constant 0 : i32
    %c0_i32_0 = arith.constant 0 : i32
    return %arg0, %c0_i32 : i32, i32
  }
}

</mosaic_0001>

<bundles_post_ra>
// kernel: tpu_custom_call.1
= control target key start
LH: loop header
LB: loop body
LE: loop exit
PB: predicated region body
PF: predicated region fallthrough
CT: control target
= control target key end

     0   :  { %12 = vsyncpa [#allocation4], 0  ;;  %s3668_s0 = inlined_call_operand.vmem [shape: s32[1,128,1], index: 0, kind: input, shape index: {}]   ;;  %s3669_s1 = inlined_call_operand.hbm [shape: bf16[32,512], index: 1, kind: input, shape index: {}]   ;;  %s3670_s2 = inlined_call_operand.hbm [shape: bf16[32,512], index: 2, kind: input, shape index: {}]   ;;  %s3671_s3 = inlined_call_operand.vmem [shape: bf16[128,512], index: 3, kind: input, shape index: {}]   ;;  %s3672_s4 = inlined_call_operand.vmem [shape: bf16[128,8], index: 4, kind: input, shape index: {}]   ;;  %s3673_s5 = inlined_call_operand.vmem [shape: bf16[128,8], index: 5, kind: input, shape index: {}]   ;;  %s3674_s6 = inlined_call_operand.vmem [shape: f32[1,8], index: 6, kind: input, shape index: {}]   ;;  %s3675_s7 = inlined_call_operand.vmem [shape: f32[16,8], index: 7, kind: output, shape index: {}]  }
   0x1   :  { %13 = vsyncpa [#allocation6], 0  ;;  %s2779_s24 = smov [#allocation3]   ;;  %s2731_s28 = scalar_lea.hbm %s3669_s1, 1024 }
   0x2   :  { %s21_s25 = sshll.u32 %s2779_s24, 4  ;;  %p2732_p0 = scmp.ne.s32.totalorder %s3669_s1, %s2731_s28  ;;  %s22_s25 = int_to_ptr.vmem [resolvable:$true] %s21_s25 }
   0x3   :  { %p2735_p1 = scmp.lt.u32.totalorder %s2731_s28, %s3669_s1 }
   0x5   :  { %p2737_p2 = pnand %p2735_p1, %p2732_p0 }
   0x7   :  { %2740 = shalt.err (!%p2737_p2)
}
   0x8   :  { %s2741_s10 = scalar_lea.vmem %s22_s25, 1024  ;;  %p2746_p4 = scmp.lt.s32.totalorder %s22_s25, %s22_s25 }
   0x9   :  { %p2742_p3 = scmp.ne.s32.totalorder %s22_s25, %s2741_s10  ;;  %p2747_p5 = scmp.lt.s32.totalorder %s2741_s10, %s2741_s10 }
   0xb   :  { %p2748_p6 = por %p2747_p5, %p2746_p4 }
   0xd   :  { %p2749_p7 = pnand %p2748_p6, %p2742_p3 }
   0xf   :  { %2752 = shalt.err (!%p2749_p7)
}
  0x10   :  { %s2780_s11 = smov 256   ;;  %s2781_s12 = smov 16  }
  0x11   :  { %27 = dma.hbm_to_vmem [thread:$0]  %s3669_s1, 1024, %s22_s25, [#allocation4], %s2780_s11, %s2780_s11, %s2781_s12  }
  0x12   :  { %s2782_s15 = smov [#allocation5]   ;;  %s2753_s19 = scalar_lea.hbm %s3670_s2, 1024 }
  0x13   :  { %s33_s16 = sshll.u32 %s2782_s15, 4  ;;  %p2754_p8 = scmp.ne.s32.totalorder %s3670_s2, %s2753_s19  ;;  %s34_s16 = int_to_ptr.vmem [resolvable:$true] %s33_s16 }
  0x14   :  { %p2757_p9 = scmp.lt.u32.totalorder %s2753_s19, %s3670_s2 }
  0x16   :  { %p2759_p10 = pnand %p2757_p9, %p2754_p8 }
  0x18   :  { %2762 = shalt.err (!%p2759_p10)
}
  0x19   :  { %s2763_s24 = scalar_lea.vmem %s34_s16, 1024  ;;  %p2768_p12 = scmp.lt.s32.totalorder %s34_s16, %s34_s16 }
  0x1a   :  { %p2764_p11 = scmp.ne.s32.totalorder %s34_s16, %s2763_s24  ;;  %p2769_p13 = scmp.lt.s32.totalorder %s2763_s24, %s2763_s24 }
  0x1c   :  { %p2770_p0 = por %p2769_p13, %p2768_p12 }
  0x1e   :  { %p2771_p1 = pnand %p2770_p0, %p2764_p11 }
  0x20   :  { %2774 = shalt.err (!%p2771_p1)
}
  0x21   :  { %39 = dma.hbm_to_vmem [thread:$0]  %s3670_s2, 1024, %s34_s16, [#allocation6], %s2780_s11, %s2780_s11, %s2781_s12  }
  0x22   :  { %2775 = dma.done.wait [#allocation4], 1024  }
  0x23   :  { %2776 = vsyncadd [#allocation4], 4294966272 }
  0x24   :  { %2777 = dma.done.wait [#allocation6], 1024  }
  0x25   :  { %2778 = vsyncadd [#allocation6], 4294966272  ;;  %v2783_v0 = vmov 0   ;;  %v57_v1 = vld [vmem:[%s3668_s0 + $0x10] sm:$0xff]  ;;  %v55_v2 = vld [vmem:[%s3668_s0] sm:$0xff]  ;;  %v71_v27 = vlaneseq  ;;  %v2784_v32 = vmov 0.0  }
  0x26   :  { %2422 = vset.pattern.permute.xlu1 %v2783_v0  ;;  %2421 = vset.pattern.permute.xlu0 %v2783_v0  ;;  %v58_v3 = vld [vmem:[%s3668_s0 + $0x18] sm:$0xff]  ;;  %v56_v4 = vld [vmem:[%s3668_s0 + $0x8] sm:$0xff]  ;;  %v59_v6 = vld [vmem:[%s3668_s0 + $0x20] sm:$0xff]  ;;  %vm225_vm2 = vcmask 261120  }
  0x27   :  { %282 = vmatprep.mubr.bf16.mxu0 %v2783_v0  ;;  %395 = vmatprep.mubr.bf16.mxu1 %v2783_v0  ;;  %v60_v5 = vld [vmem:[%s3668_s0 + $0x28] sm:$0xff]  ;;  %v2423_v7 = vld [vmem:[#allocation3 + $0x4] ss:$16 sps:$4 sm:$0xff]   ;;  %v2427_v9 = vld [vmem:[#allocation3] ss:$16 sps:$4 sm:$0xff]   ;;  %v2902_v28 = vand.u32 127, %v71_v27 }
  0x28   :  { %80 = vperm.xlu1 %2422, %v57_v1   ;;  %74 = vperm.xlu0 %2421, %v55_v2   ;;  %v2425_v8 = vld [vmem:[#allocation3 + $0xc] ss:$16 sps:$4 sm:$0xff]   ;;  %v2428_v10 = vld [vmem:[#allocation3 + $0x8] ss:$16 sps:$4 sm:$0xff]   ;;  %v61_v12 = vld [vmem:[%s3668_s0 + $0x30] sm:$0xff] }
  0x29   :  { %v62_v11 = vld [vmem:[%s3668_s0 + $0x38] sm:$0xff]  ;;  %250 = vmatprep.subr.bf16.mxu0 %v2423_v7  ;;  %v2429_v13 = vld [vmem:[#allocation3 + $0x24] ss:$16 sps:$4 sm:$0xff]   ;;  %363 = vmatprep.subr.bf16.mxu1 %v2425_v8  ;;  %v2433_v15 = vld [vmem:[#allocation3 + $0x20] ss:$16 sps:$4 sm:$0xff]  }
  0x2a   :  { %v2431_v14 = vld [vmem:[#allocation3 + $0x2c] ss:$16 sps:$4 sm:$0xff]   ;;  %251 = vmatpush1.bf16.msra.mxu0 %v2427_v9  ;;  %v2434_v16 = vld [vmem:[#allocation3 + $0x28] ss:$16 sps:$4 sm:$0xff]   ;;  %364 = vmatpush1.bf16.msra.mxu1 %v2428_v10  ;;  %v63_v18 = vld [vmem:[%s3668_s0 + $0x40] sm:$0xff] }
  0x2b   :  { %252 = vmatprep.subr.bf16.mxu0 %v2429_v13  ;;  %v64_v17 = vld [vmem:[%s3668_s0 + $0x48] sm:$0xff]  ;;  %365 = vmatprep.subr.bf16.mxu1 %v2431_v14  ;;  %v66_v19 = vld [vmem:[%s3668_s0 + $0x58] sm:$0xff]  ;;  %v65_v20 = vld [vmem:[%s3668_s0 + $0x50] sm:$0xff] }
  0x2c   :  { %83 = vperm.xlu1 %2422, %v58_v3   ;;  %77 = vperm.xlu0 %2421, %v56_v4   ;;  %v68_v21 = vld [vmem:[%s3668_s0 + $0x68] sm:$0xff]  ;;  %v67_v22 = vld [vmem:[%s3668_s0 + $0x60] sm:$0xff]  ;;  %v70_v23 = vld [vmem:[%s3668_s0 + $0x78] sm:$0xff] }
  0x2d   :  { %v69_v24 = vld [vmem:[%s3668_s0 + $0x70] sm:$0xff]  ;;  %v2440_v26 = vld [vmem:[#allocation5 + $0xc] ss:$16 sps:$4 sm:$0xff]   ;;  %v2438_v38 = vld [vmem:[#allocation5 + $0x8] ss:$16 sps:$4 sm:$0xff]  }
  0x2e   :  { %253 = vmatpush1.bf16.msra.mxu0 %v2433_v15  ;;  %366 = vmatpush1.bf16.msra.mxu1 %v2434_v16  ;;  %v2437_v25 = vld [vmem:[#allocation5 + $0x4] ss:$16 sps:$4 sm:$0xff]   ;;  %v2435_v37 = vld [vmem:[#allocation5] ss:$16 sps:$4 sm:$0xff]   ;;  %v2446_v40 = vld [vmem:[#allocation5 + $0x2c] ss:$16 sps:$4 sm:$0xff]  }
  0x2f   :  { %588 = vmatprep.subr.bf16.mxu0 %v2437_v25  ;;  %631 = vmatprep.subr.bf16.mxu1 %v2440_v26  ;;  %v2443_v39 = vld [vmem:[#allocation5 + $0x24] ss:$16 sps:$4 sm:$0xff]   ;;  %v2441_v43 = vld [vmem:[#allocation5 + $0x20] ss:$16 sps:$4 sm:$0xff]   ;;  %v2444_v44 = vld [vmem:[#allocation5 + $0x28] ss:$16 sps:$4 sm:$0xff]  }
  0x30   :  { %89 = vperm.xlu1 %2422, %v60_v5   ;;  %86 = vperm.xlu0 %2421, %v59_v6   ;;  %v2975_v13 = vld [vmem:[%s3671_s3 + $0x4] ss:$16 sps:$4 sm:$0xff]   ;;  %v2980_v14 = vld [vmem:[%s3671_s3 + $0xc] ss:$16 sps:$4 sm:$0xff]   ;;  %v2985_v15 = vld [vmem:[%s3671_s3] ss:$16 sps:$4 sm:$0xff]  }
  0x31   :  { %v2990_v16 = vld [vmem:[%s3671_s3 + $0x8] ss:$16 sps:$4 sm:$0xff]   ;;  %v3047_v25 = vld [vmem:[%s3671_s3 + $0x64] ss:$16 sps:$4 sm:$0xff]   ;;  %v3052_v26 = vld [vmem:[%s3671_s3 + $0x6c] ss:$16 sps:$4 sm:$0xff]  }
  0x32   :  { %v3057_v27 = vld [vmem:[%s3671_s3 + $0x60] ss:$16 sps:$4 sm:$0xff]  }
  0x34   :  { %95 = vperm.xlu1 %2422, %v62_v11   ;;  %92 = vperm.xlu0 %2421, %v61_v12  }
  0x38   :  { %101 = vperm.xlu1 %2422, %v64_v17   ;;  %98 = vperm.xlu0 %2421, %v63_v18   ;;  %v2999_v17 = vld [vmem:[%s3671_s3 + $0x24] ss:$16 sps:$4 sm:$0xff]   ;;  %v3004_v18 = vld [vmem:[%s3671_s3 + $0x2c] ss:$16 sps:$4 sm:$0xff]  }
  0x3c   :  { %107 = vperm.xlu1 %2422, %v66_v19   ;;  %104 = vperm.xlu0 %2421, %v65_v20   ;;  %v3009_v19 = vld [vmem:[%s3671_s3 + $0x20] ss:$16 sps:$4 sm:$0xff]   ;;  %v3014_v20 = vld [vmem:[%s3671_s3 + $0x28] ss:$16 sps:$4 sm:$0xff]  }
  0x40   :  { %113 = vperm.xlu1 %2422, %v68_v21   ;;  %110 = vperm.xlu0 %2421, %v67_v22   ;;  %v3023_v21 = vld [vmem:[%s3671_s3 + $0x44] ss:$16 sps:$4 sm:$0xff]   ;;  %v3028_v22 = vld [vmem:[%s3671_s3 + $0x4c] ss:$16 sps:$4 sm:$0xff]  }
  0x44   :  { %119 = vperm.xlu1 %2422, %v70_v23   ;;  %116 = vperm.xlu0 %2421, %v69_v24   ;;  %v3033_v23 = vld [vmem:[%s3671_s3 + $0x40] ss:$16 sps:$4 sm:$0xff]   ;;  %v3038_v24 = vld [vmem:[%s3671_s3 + $0x48] ss:$16 sps:$4 sm:$0xff]  }
  0xa7   :  { %v81_v29 = vpop.permute.xlu1 %80  ;;  %v75_v30 = vpop.permute.xlu0 %74 }
  0xa8   :  { %vm121_vm0 = vcmp.eq.s32.totalorder %v75_v30, %v2902_v28  ;;  %vm123_vm3 = vcmp.eq.s32.totalorder %v81_v29, %v2902_v28  ;;  %v3071_v29 = vld [vmem:[%s3671_s3 + $0x84] ss:$16 sps:$4 sm:$0xff]   ;;  %v3076_v30 = vld [vmem:[%s3671_s3 + $0x8c] ss:$16 sps:$4 sm:$0xff]  }
  0xa9   :  { %v2201_v33 = vsel %vm121_vm0, 1.0, %v2784_v32  ;;  %v2203_v41 = vsel %vm123_vm3, 1.0, %v2784_v32 }
  0xab   :  { %v78_v31 = vpop.permute.xlu0 %77  ;;  %v84_v34 = vpop.permute.xlu1 %83 }
  0xac   :  { %vm122_vm1 = vcmp.eq.s32.totalorder %v78_v31, %v2902_v28  ;;  %vm124_vm4 = vcmp.eq.s32.totalorder %v84_v34, %v2902_v28  ;;  %v3081_v31 = vld [vmem:[%s3671_s3 + $0x80] ss:$16 sps:$4 sm:$0xff]   ;;  %v3095_v34 = vld [vmem:[%s3671_s3 + $0xa4] ss:$16 sps:$4 sm:$0xff]  }
  0xad   :  { %v2202_v35 = vsel %vm122_vm1, 1.0, %v2784_v32  ;;  %v2204_v42 = vsel %vm124_vm4, 1.0, %v2784_v32  ;;  %vm2785_vm1 = vmmov 0  }
  0xae   :  { %v169_v36 = vpack.c.bf16 %v2202_v35, %v2201_v33  ;;  %v170_v45 = vpack.c.bf16 %v2204_v42, %v2203_v41  ;;  %v3086_v33 = vld [vmem:[%s3671_s3 + $0x88] ss:$16 sps:$4 sm:$0xff]   ;;  %v3100_v35 = vld [vmem:[%s3671_s3 + $0xac] ss:$16 sps:$4 sm:$0xff]   ;;  %v3143_v42 = vld [vmem:[%s3671_s3 + $0xe4] ss:$16 sps:$4 sm:$0xff]  }
  0xaf   :  { %v90_v46 = vpop.permute.xlu1 %89  ;;  %v87_v47 = vpop.permute.xlu0 %86  ;;  %v3134_v41 = vld [vmem:[%s3671_s3 + $0xc8] ss:$16 sps:$4 sm:$0xff]  }
  0xb0   :  { %2225 = vmatmul.mubr.msk.bf16.vlgmr.msra.gmra.mrb[0].mxu0 %vm225_vm2, %v169_v36  ;;  %2233 = vmatmul.mubr.msk.bf16.vlgmr.msra.gmra.mrb[0].mxu1 %vm225_vm2, %v169_v36  ;;  %vm126_vm5 = vcmp.eq.s32.totalorder %v90_v46, %v2902_v28  ;;  %vm125_vm6 = vcmp.eq.s32.totalorder %v87_v47, %v2902_v28  ;;  %v3105_v36 = vld [vmem:[%s3671_s3 + $0xa0] ss:$16 sps:$4 sm:$0xff]  }
  0xb1   :  { %292 = vmatprep.mubr.bf16.mxu0 %v2783_v0  ;;  %405 = vmatprep.mubr.bf16.mxu1 %v2783_v0  ;;  %v2206_v48 = vsel %vm126_vm5, 1.0, %v2784_v32  ;;  %v2205_v49 = vsel %vm125_vm6, 1.0, %v2784_v32 }
  0xb2   :  { %589 = vmatpush1.bf16.msra.mxu0 %v2435_v37  ;;  %632 = vmatpush1.bf16.msra.mxu1 %v2438_v38  ;;  %v171_v52 = vpack.c.bf16 %v2206_v48, %v2205_v49  ;;  %v3110_v37 = vld [vmem:[%s3671_s3 + $0xa8] ss:$16 sps:$4 sm:$0xff]   ;;  %v3119_v38 = vld [vmem:[%s3671_s3 + $0xc4] ss:$16 sps:$4 sm:$0xff]  }
  0xb3   :  { %590 = vmatprep.subr.bf16.mxu0 %v2443_v39  ;;  %633 = vmatprep.subr.bf16.mxu1 %v2446_v40  ;;  %v96_v50 = vpop.permute.xlu1 %95  ;;  %v93_v51 = vpop.permute.xlu0 %92  ;;  %v3124_v39 = vld [vmem:[%s3671_s3 + $0xcc] ss:$16 sps:$4 sm:$0xff]   ;;  %v3129_v40 = vld [vmem:[%s3671_s3 + $0xc0] ss:$16 sps:$4 sm:$0xff]  }
  0xb4   :  { %vm128_vm7 = vcmp.eq.s32.totalorder %v96_v50, %v2902_v28  ;;  %vm127_vm8 = vcmp.eq.s32.totalorder %v93_v51, %v2902_v28 }
  0xb5   :  { %v2208_v53 = vsel %vm128_vm7, 1.0, %v2784_v32  ;;  %v2207_v54 = vsel %vm127_vm8, 1.0, %v2784_v32 }
  0xb6   :  { %591 = vmatpush1.bf16.msra.mxu0 %v2441_v43  ;;  %634 = vmatpush1.bf16.msra.mxu1 %v2444_v44  ;;  %v172_v57 = vpack.c.bf16 %v2208_v53, %v2207_v54  ;;  %v3148_v43 = vld [vmem:[%s3671_s3 + $0xec] ss:$16 sps:$4 sm:$0xff]   ;;  %v3153_v44 = vld [vmem:[%s3671_s3 + $0xe0] ss:$16 sps:$4 sm:$0xff]  }
  0xb7   :  { %v102_v55 = vpop.permute.xlu1 %101  ;;  %v99_v56 = vpop.permute.xlu0 %98  ;;  %922 = vmatprep.subr.bf16.mxu0 %v2975_v13  ;;  %965 = vmatprep.subr.bf16.mxu1 %v2980_v14 }
  0xb8   :  { %2226 = vmatmul.mubr.msk.bf16.gmra.mrb[4].mxu0 %vm225_vm2, %v170_v45  ;;  %2234 = vmatmul.mubr.msk.bf16.gmra.mrb[4].mxu1 %vm225_vm2, %v170_v45  ;;  %vm130_vm9 = vcmp.eq.s32.totalorder %v102_v55, %v2902_v28  ;;  %vm129_vm10 = vcmp.eq.s32.totalorder %v99_v56, %v2902_v28  ;;  %v3158_v45 = vld [vmem:[%s3671_s3 + $0xe8] ss:$16 sps:$4 sm:$0xff]  }
  0xb9   :  { %302 = vmatprep.mubr.bf16.mxu0 %v2783_v0  ;;  %415 = vmatprep.mubr.bf16.mxu1 %v2783_v0  ;;  %v2210_v58 = vsel %vm130_vm9, 1.0, %v2784_v32  ;;  %v2209_v59 = vsel %vm129_vm10, 1.0, %v2784_v32 }
  0xba   :  { %v173_v62 = vpack.c.bf16 %v2210_v58, %v2209_v59 }
  0xbb   :  { %v108_v60 = vpop.permute.xlu1 %107  ;;  %v105_v61 = vpop.permute.xlu0 %104 }
  0xbc   :  { %vm132_vm11 = vcmp.eq.s32.totalorder %v108_v60, %v2902_v28  ;;  %vm131_vm12 = vcmp.eq.s32.totalorder %v105_v61, %v2902_v28 }
  0xbd   :  { %v2212_v63 = vsel %vm132_vm11, 1.0, %v2784_v32  ;;  %v2211_v1 = vsel %vm131_vm12, 1.0, %v2784_v32 }
  0xbe   :  { %v174_v4 = vpack.c.bf16 %v2212_v63, %v2211_v1 }
  0xbf   :  { %v114_v2 = vpop.permute.xlu1 %113  ;;  %v111_v3 = vpop.permute.xlu0 %110 }
  0xc0   :  { %2227 = vmatmul.mubr.msk.bf16.gmra.mrb[8].mxu0 %vm225_vm2, %v171_v52  ;;  %2235 = vmatmul.mubr.msk.bf16.gmra.mrb[8].mxu1 %vm225_vm2, %v171_v52  ;;  %vm134_vm13 = vcmp.eq.s32.totalorder %v114_v2, %v2902_v28  ;;  %vm133_vm14 = vcmp.eq.s32.totalorder %v111_v3, %v2902_v28 }
  0xc1   :  { %312 = vmatprep.mubr.bf16.mxu0 %v2783_v0  ;;  %425 = vmatprep.mubr.bf16.mxu1 %v2783_v0  ;;  %v2214_v5 = vsel %vm134_vm13, 1.0, %v2784_v32  ;;  %v2213_v6 = vsel %vm133_vm14, 1.0, %v2784_v32 }
  0xc2   :  { %v175_v9 = vpack.c.bf16 %v2214_v5, %v2213_v6 }
  0xc3   :  { %v120_v7 = vpop.permute.xlu1 %119  ;;  %v117_v8 = vpop.permute.xlu0 %116 }
  0xc4   :  { %vm136_vm15 = vcmp.eq.s32.totalorder %v120_v7, %v2902_v28  ;;  %vm135_vm0 = vcmp.eq.s32.totalorder %v117_v8, %v2902_v28  ;;  %v3062_v28 = vld [vmem:[%s3671_s3 + $0x68] ss:$16 sps:$4 sm:$0xff]  }
  0xc5   :  { %v2216_v10 = vsel %vm136_vm15, 1.0, %v2784_v32  ;;  %v2215_v11 = vsel %vm135_vm0, 1.0, %v2784_v32 }
  0xc6   :  { %v176_v12 = vpack.c.bf16 %v2216_v10, %v2215_v11 }
  0xc8   :  { %2228 = vmatmul.mubr.msk.bf16.gmra.mrb[12].mxu0 %vm225_vm2, %v172_v57  ;;  %2236 = vmatmul.mubr.msk.bf16.gmra.mrb[12].mxu1 %vm225_vm2, %v172_v57 }
  0xc9   :  { %322 = vmatprep.mubr.bf16.mxu0 %v2783_v0  ;;  %435 = vmatprep.mubr.bf16.mxu1 %v2783_v0 }
  0xd0   :  { %2229 = vmatmul.mubr.msk.bf16.gmra.mrb[16].mxu0 %vm225_vm2, %v173_v62  ;;  %2237 = vmatmul.mubr.msk.bf16.gmra.mrb[16].mxu1 %vm225_vm2, %v173_v62 }
  0xd1   :  { %332 = vmatprep.mubr.bf16.mxu0 %v2783_v0  ;;  %445 = vmatprep.mubr.bf16.mxu1 %v2783_v0 }
  0xd8   :  { %2230 = vmatmul.mubr.msk.bf16.gmra.mrb[20].mxu0 %vm225_vm2, %v174_v4  ;;  %2238 = vmatmul.mubr.msk.bf16.gmra.mrb[20].mxu1 %vm225_vm2, %v174_v4 }
  0xd9   :  { %342 = vmatprep.mubr.bf16.mxu0 %v2783_v0  ;;  %455 = vmatprep.mubr.bf16.mxu1 %v2783_v0 }
  0xe0   :  { %2231 = vmatmul.mubr.msk.bf16.gmra.mrb[24].mxu0 %vm225_vm2, %v175_v9  ;;  %2239 = vmatmul.mubr.msk.bf16.gmra.mrb[24].mxu1 %vm225_vm2, %v175_v9 }
  0xe1   :  { %352 = vmatprep.mubr.bf16.mxu0 %v2783_v0  ;;  %465 = vmatprep.mubr.bf16.mxu1 %v2783_v0 }
  0xe8   :  { %2232 = vmatmul.mubr.msk.bf16.gmra.mrb[28].mxu0 %vm225_vm2, %v176_v12  ;;  %2240 = vmatmul.mubr.msk.bf16.gmra.mrb[28].mxu1 %vm225_vm2, %v176_v12 }
  0xe9   :  { %620 = vmatprep.mubr.bf16.mxu0 %v2783_v0  ;;  %663 = vmatprep.mubr.bf16.mxu1 %v2783_v0 }
  0xf0   :  { %2249 = vmatmul.mubr.msk.bf16.vlgmr.msra.gmra.mrb[32].mxu0 %vm225_vm2, %v176_v12  ;;  %2250 = vmatmul.mubr.msk.bf16.vlgmr.msra.gmra.mrb[32].mxu1 %vm225_vm2, %v176_v12  ;;  %vm2161_vm2 = vcmask 64512  }
  0xf1   :  { %954 = vmatprep.mubr.bf16.mxu0 %v2783_v0  ;;  %997 = vmatprep.mubr.bf16.mxu1 %v2783_v0 }
  0xf2   :  { %923 = vmatpush1.bf16.msra.mxu0 %v2985_v15  ;;  %966 = vmatpush1.bf16.msra.mxu1 %v2990_v16 }
  0xf3   :  { %924 = vmatprep.subr.bf16.mxu0 %v2999_v17  ;;  %967 = vmatprep.subr.bf16.mxu1 %v3004_v18 }
  0xf6   :  { %925 = vmatpush1.bf16.msra.mxu0 %v3009_v19  ;;  %968 = vmatpush1.bf16.msra.mxu1 %v3014_v20 }
  0xf7   :  { %926 = vmatprep.subr.bf16.mxu0 %v3023_v21  ;;  %969 = vmatprep.subr.bf16.mxu1 %v3028_v22 }
  0xfa   :  { %927 = vmatpush1.bf16.msra.mxu0 %v3033_v23  ;;  %970 = vmatpush1.bf16.msra.mxu1 %v3038_v24 }
  0xfb   :  { %928 = vmatprep.subr.bf16.mxu0 %v3047_v25  ;;  %971 = vmatprep.subr.bf16.mxu1 %v3052_v26 }
  0xfe   :  { %929 = vmatpush1.bf16.msra.mxu0 %v3057_v27  ;;  %972 = vmatpush1.bf16.msra.mxu1 %v3062_v28 }
  0xff   :  { %930 = vmatprep.subr.bf16.mxu0 %v3071_v29  ;;  %973 = vmatprep.subr.bf16.mxu1 %v3076_v30 }
 0x102   :  { %931 = vmatpush1.bf16.msra.mxu0 %v3081_v31  ;;  %974 = vmatpush1.bf16.msra.mxu1 %v3086_v33 }
 0x103   :  { %932 = vmatprep.subr.bf16.mxu0 %v3095_v34  ;;  %975 = vmatprep.subr.bf16.mxu1 %v3100_v35 }
 0x106   :  { %933 = vmatpush1.bf16.msra.mxu0 %v3105_v36  ;;  %976 = vmatpush1.bf16.msra.mxu1 %v3110_v37 }
 0x107   :  { %934 = vmatprep.subr.bf16.mxu0 %v3119_v38  ;;  %977 = vmatprep.subr.bf16.mxu1 %v3124_v39 }
 0x10a   :  { %935 = vmatpush1.bf16.msra.mxu0 %v3129_v40  ;;  %978 = vmatpush1.bf16.msra.mxu1 %v3134_v41 }
 0x10b   :  { %936 = vmatprep.subr.bf16.mxu0 %v3143_v42  ;;  %979 = vmatprep.subr.bf16.mxu1 %v3148_v43 }
 0x10e   :  { %937 = vmatpush1.bf16.msra.mxu0 %v3153_v44  ;;  %980 = vmatpush1.bf16.msra.mxu1 %v3158_v45 }
 0x10f   :  { %1064 = vmatprep.subr.bf16.mxu0 %v2975_v13  ;;  %1107 = vmatprep.subr.bf16.mxu1 %v2980_v14 }
 0x183   :  { %v284_v46 = vpop.f32.mrb[0].mxu0  ;;  %v397_v47 = vpop.f32.mrb[0].mxu1 }
 0x184   :  { %v714_v48 = vmul.f32 0.5, %v284_v46  ;;  %v286_v49 = vpop.f32.mrb[1].mxu0  ;;  %v399_v50 = vpop.f32.mrb[1].mxu1 }
 0x185   :  { %v722_v51 = vmul.f32 0.5, %v286_v49  ;;  %v288_v52 = vpop.f32.mrb[2].mxu0  ;;  %v401_v53 = vpop.f32.mrb[2].mxu1  ;;  %v732_v61 = vmul.f32 0.5, %v399_v50 }
 0x186   :  { %2511 = vtanh.f32 %v714_v48  ;;  %v715_v54 = vmul.f32 0.5, %v288_v52  ;;  %v290_v55 = vpop.f32.mrb[3].mxu0  ;;  %v403_v56 = vpop.f32.mrb[3].mxu1 }
 0x187   :  { %2513 = vtanh.f32 %v722_v51  ;;  %v723_v57 = vmul.f32 0.5, %v290_v55  ;;  %v733_v63 = vmul.f32 0.5, %v403_v56 }
 0x188   :  { %2515 = vtanh.f32 %v715_v54 }
 0x189   :  { %2517 = vtanh.f32 %v397_v47 }
 0x18a   :  { %2519 = vtanh.f32 %v723_v57 }
 0x18b   :  { %2521 = vtanh.f32 %v401_v53 }
 0x18c   :  { %2523 = vtanh.f32 %v732_v61 }
 0x18d   :  { %2525 = vtanh.f32 %v733_v63 }
 0x190   :  { %v2512_v58 = vpop.eup %2511 }
 0x191   :  { %v2514_v59 = vpop.eup %2513  ;;  %v718_v60 = vadd.f32 1.0, %v2512_v58 }
 0x192   :  { %v726_v62 = vadd.f32 1.0, %v2514_v59  ;;  %v2516_v1 = vpop.eup %2515 }
 0x193   :  { %v720_v2 = vmul.f32 0.5, %v718_v60  ;;  %v2518_v3 = vpop.eup %2517  ;;  %v719_v5 = vadd.f32 1.0, %v2516_v1 }
 0x194   :  { %v728_v4 = vmul.f32 0.5, %v726_v62  ;;  %v2520_v6 = vpop.eup %2519 }
 0x195   :  { %v742_v7 = vmul.f32 %v2518_v3, %v720_v2  ;;  %v721_v9 = vmul.f32 0.5, %v719_v5  ;;  %v727_v10 = vadd.f32 1.0, %v2520_v6  ;;  %v2522_v11 = vpop.eup %2521 }
 0x196   :  { %v740_v8 = vmul.f32 0.0, %v728_v4  ;;  %v2524_v50 = vpop.eup %2523 }
 0x197   :  { %v729_v46 = vmul.f32 0.5, %v727_v10  ;;  %v743_v47 = vmul.f32 %v2522_v11, %v721_v9  ;;  %v2526_v51 = vpop.eup %2525  ;;  %v736_v52 = vadd.f32 1.0, %v2524_v50 }
 0x198   :  { %v3166_v12 = vadd.f32 %v742_v7, %v740_v8  ;;  %v737_v53 = vadd.f32 1.0, %v2526_v51 }
 0x199   :  { %v741_v48 = vmul.f32 0.0, %v729_v46  ;;  %v738_v55 = vmul.f32 0.5, %v736_v52 }
 0x19a   :  { %2527 = vtanh.f32 %v3166_v12  ;;  %v739_v56 = vmul.f32 0.5, %v737_v53 }
 0x19b   :  { %v3169_v49 = vadd.f32 %v743_v47, %v741_v48 }
 0x19d   :  { %2529 = vtanh.f32 %v3169_v49 }
 0x1a4   :  { %v2528_v54 = vpop.eup %2527 }
 0x1a5   :  { %v748_v58 = vmul.f32 %v2528_v54, %v738_v55 }
 0x1a7   :  { %v2530_v57 = vpop.eup %2529 }
 0x1a8   :  { %v749_v59 = vmul.f32 %v2530_v57, %v739_v56 }
 0x1aa   :  { %v761_v60 = vpack.c.bf16 %v749_v59, %v748_v58 }
 0x1ac   :  { %955 = vmatmul.mubr.bf16.vlgmr.msra.gmra.mrb[4].mxu0 %v761_v60  ;;  %998 = vmatmul.mubr.bf16.vlgmr.msra.gmra.mrb[4].mxu1 %v761_v60 }
 0x1ad   :  { %1065 = vmatpush1.bf16.msra.mxu0 %v2985_v15  ;;  %1108 = vmatpush1.bf16.msra.mxu1 %v2990_v16 }
 0x1ae   :  { %1066 = vmatprep.subr.bf16.mxu0 %v2999_v17  ;;  %1109 = vmatprep.subr.bf16.mxu1 %v3004_v18 }
 0x1af   :  { %1096 = vmatprep.mubr.bf16.mxu0 %v2783_v0  ;;  %1139 = vmatprep.mubr.bf16.mxu1 %v2783_v0 }
 0x1b1   :  { %1067 = vmatpush1.bf16.msra.mxu0 %v3009_v19  ;;  %1110 = vmatpush1.bf16.msra.mxu1 %v3014_v20 }
 0x1b2   :  { %1068 = vmatprep.subr.bf16.mxu0 %v3023_v21  ;;  %1111 = vmatprep.subr.bf16.mxu1 %v3028_v22 }
 0x1b5   :  { %1069 = vmatpush1.bf16.msra.mxu0 %v3033_v23  ;;  %1112 = vmatpush1.bf16.msra.mxu1 %v3038_v24 }
 0x1b6   :  { %1070 = vmatprep.subr.bf16.mxu0 %v3047_v25  ;;  %1113 = vmatprep.subr.bf16.mxu1 %v3052_v26 }
 0x1b9   :  { %1071 = vmatpush1.bf16.msra.mxu0 %v3057_v27  ;;  %1114 = vmatpush1.bf16.msra.mxu1 %v3062_v28 }
 0x1ba   :  { %1072 = vmatprep.subr.bf16.mxu0 %v3071_v29  ;;  %1115 = vmatprep.subr.bf16.mxu1 %v3076_v30 }
 0x1bd   :  { %1073 = vmatpush1.bf16.msra.mxu0 %v3081_v31  ;;  %1116 = vmatpush1.bf16.msra.mxu1 %v3086_v33 }
 0x1be   :  { %1074 = vmatprep.subr.bf16.mxu0 %v3095_v34  ;;  %1117 = vmatprep.subr.bf16.mxu1 %v3100_v35 }
 0x1c1   :  { %1075 = vmatpush1.bf16.msra.mxu0 %v3105_v36  ;;  %1118 = vmatpush1.bf16.msra.mxu1 %v3110_v37 }
 0x1c2   :  { %1076 = vmatprep.subr.bf16.mxu0 %v3119_v38  ;;  %1119 = vmatprep.subr.bf16.mxu1 %v3124_v39 }
 0x1c3   :  { %v622_v61 = vpop.f32.mrb[32].mxu0  ;;  %v665_v62 = vpop.f32.mrb[32].mxu1 }
 0x1c4   :  { %v1904_v63 = vmul.f32 0.5, %v622_v61  ;;  %v624_v1 = vpop.f32.mrb[33].mxu0  ;;  %v667_v2 = vpop.f32.mrb[33].mxu1 }
 0x1c5   :  { %v1912_v3 = vmul.f32 0.5, %v624_v1  ;;  %v626_v4 = vpop.f32.mrb[34].mxu0  ;;  %v669_v5 = vpop.f32.mrb[34].mxu1  ;;  %1077 = vmatpush1.bf16.msra.mxu0 %v3129_v40  ;;  %1120 = vmatpush1.bf16.msra.mxu1 %v3134_v41  ;;  %v1922_v10 = vmul.f32 0.5, %v667_v2 }
 0x1c6   :  { %2531 = vtanh.f32 %v1904_v63  ;;  %v1905_v6 = vmul.f32 0.5, %v626_v4  ;;  %v628_v7 = vpop.f32.mrb[35].mxu0  ;;  %v671_v8 = vpop.f32.mrb[35].mxu1  ;;  %1078 = vmatprep.subr.bf16.mxu0 %v3143_v42  ;;  %1121 = vmatprep.subr.bf16.mxu1 %v3148_v43 }
 0x1c7   :  { %2533 = vtanh.f32 %v1912_v3  ;;  %v1913_v9 = vmul.f32 0.5, %v628_v7  ;;  %v1923_v50 = vmul.f32 0.5, %v671_v8 }
 0x1c8   :  { %2535 = vtanh.f32 %v1905_v6 }
 0x1c9   :  { %2537 = vtanh.f32 %v665_v62  ;;  %1079 = vmatpush1.bf16.msra.mxu0 %v3153_v44  ;;  %1122 = vmatpush1.bf16.msra.mxu1 %v3158_v45 }
 0x1ca   :  { %2539 = vtanh.f32 %v1913_v9  ;;  %1206 = vmatprep.subr.bf16.mxu0 %v2975_v13  ;;  %1249 = vmatprep.subr.bf16.mxu1 %v2980_v14 }
 0x1cb   :  { %2541 = vtanh.f32 %v669_v5 }
 0x1cc   :  { %2543 = vtanh.f32 %v1922_v10 }
 0x1cd   :  { %2545 = vtanh.f32 %v1923_v50 }
 0x1d0   :  { %v2532_v11 = vpop.eup %2531 }
 0x1d1   :  { %v2534_v46 = vpop.eup %2533  ;;  %v1908_v47 = vadd.f32 1.0, %v2532_v11 }
 0x1d2   :  { %v1916_v48 = vadd.f32 1.0, %v2534_v46  ;;  %v2536_v51 = vpop.eup %2535 }
 0x1d3   :  { %v1910_v52 = vmul.f32 0.5, %v1908_v47  ;;  %v2538_v53 = vpop.eup %2537  ;;  %v1909_v55 = vadd.f32 1.0, %v2536_v51 }
 0x1d4   :  { %v1918_v54 = vmul.f32 0.5, %v1916_v48  ;;  %v2540_v56 = vpop.eup %2539 }
 0x1d5   :  { %v1932_v57 = vmul.f32 %v2538_v53, %v1910_v52  ;;  %v1911_v59 = vmul.f32 0.5, %v1909_v55  ;;  %v1917_v60 = vadd.f32 1.0, %v2540_v56  ;;  %v2542_v61 = vpop.eup %2541 }
 0x1d6   :  { %v1930_v58 = vmul.f32 0.0, %v1918_v54  ;;  %v2544_v3 = vpop.eup %2543 }
 0x1d7   :  { %v1919_v63 = vmul.f32 0.5, %v1917_v60  ;;  %v1933_v1 = vmul.f32 %v2542_v61, %v1911_v59  ;;  %v1926_v5 = vadd.f32 1.0, %v2544_v3  ;;  %v2546_v6 = vpop.eup %2545 }
 0x1d8   :  { %v1934_v62 = vadd.f32 %v1932_v57, %v1930_v58  ;;  %v1927_v8 = vadd.f32 1.0, %v2546_v6 }
 0x1d9   :  { %v1931_v2 = vmul.f32 0.0, %v1919_v63  ;;  %v1928_v7 = vmul.f32 0.5, %v1926_v5 }
 0x1da   :  { %2547 = vtanh.f32 %v1934_v62  ;;  %v1929_v11 = vmul.f32 0.5, %v1927_v8 }
 0x1db   :  { %v1935_v4 = vadd.f32 %v1933_v1, %v1931_v2 }
 0x1dd   :  { %2549 = vtanh.f32 %v1935_v4 }
 0x1e4   :  { %v2548_v9 = vpop.eup %2547 }
 0x1e5   :  { %v3206_v10 = vmul.f32 %v2548_v9, %v1928_v7 }
 0x1e7   :  { %v2550_v46 = vpop.eup %2549 }
 0x1e8   :  { %v3208_v47 = vmul.f32 %v2550_v46, %v1929_v11 }
 0x1ea   :  { %v1957_v48 = vpack.c.bf16 %v3208_v47, %v3206_v10  ;;  %v2506_v10 = vld [vmem:[%s3672_s4 + $0x18] sm:$0xff]   ;;  %v2507_v47 = vld [vmem:[%s3672_s4 + $0x20] sm:$0xff]  }
 0x27f   :  { %v956_v50 = vpop.f32.mrb[4].mxu0  ;;  %v999_v51 = vpop.f32.mrb[4].mxu1 }
 0x280   :  { %v1016_v52 = vmul.f32 0.5, %v956_v50  ;;  %v958_v53 = vpop.f32.mrb[5].mxu0  ;;  %v1001_v54 = vpop.f32.mrb[5].mxu1 }
 0x281   :  { %v1024_v55 = vmul.f32 0.5, %v958_v53  ;;  %v960_v56 = vpop.f32.mrb[6].mxu0  ;;  %v1003_v57 = vpop.f32.mrb[6].mxu1  ;;  %v1034_v2 = vmul.f32 0.5, %v1001_v54 }
 0x282   :  { %2551 = vtanh.f32 %v1016_v52  ;;  %v1017_v58 = vmul.f32 0.5, %v960_v56  ;;  %v962_v59 = vpop.f32.mrb[7].mxu0  ;;  %v1005_v60 = vpop.f32.mrb[7].mxu1 }
 0x283   :  { %2553 = vtanh.f32 %v1024_v55  ;;  %v1025_v61 = vmul.f32 0.5, %v962_v59  ;;  %v1035_v4 = vmul.f32 0.5, %v1005_v60 }
 0x284   :  { %2555 = vtanh.f32 %v1017_v58 }
 0x285   :  { %2557 = vtanh.f32 %v999_v51 }
 0x286   :  { %2559 = vtanh.f32 %v1025_v61 }
 0x287   :  { %2561 = vtanh.f32 %v1003_v57 }
 0x288   :  { %2563 = vtanh.f32 %v1034_v2 }
 0x289   :  { %2565 = vtanh.f32 %v1035_v4 }
 0x28c   :  { %v2552_v62 = vpop.eup %2551 }
 0x28d   :  { %v2554_v63 = vpop.eup %2553  ;;  %v1020_v1 = vadd.f32 1.0, %v2552_v62 }
 0x28e   :  { %v1028_v3 = vadd.f32 1.0, %v2554_v63  ;;  %v2556_v5 = vpop.eup %2555 }
 0x28f   :  { %v1022_v6 = vmul.f32 0.5, %v1020_v1  ;;  %v2558_v7 = vpop.eup %2557  ;;  %v1021_v9 = vadd.f32 1.0, %v2556_v5 }
 0x290   :  { %v1030_v8 = vmul.f32 0.5, %v1028_v3  ;;  %v2560_v11 = vpop.eup %2559 }
 0x291   :  { %v1044_v46 = vmul.f32 %v2558_v7, %v1022_v6  ;;  %v1023_v52 = vmul.f32 0.5, %v1021_v9  ;;  %v1029_v51 = vadd.f32 1.0, %v2560_v11  ;;  %v2562_v53 = vpop.eup %2561 }
 0x292   :  { %v1042_v50 = vmul.f32 %v1030_v8, %v3166_v12  ;;  %v2564_v59 = vpop.eup %2563 }
 0x293   :  { %v1031_v56 = vmul.f32 0.5, %v1029_v51  ;;  %v1045_v54 = vmul.f32 %v2562_v53, %v1023_v52  ;;  %v2566_v60 = vpop.eup %2565  ;;  %v1038_v61 = vadd.f32 1.0, %v2564_v59 }
 0x294   :  { %v3213_v55 = vadd.f32 %v1044_v46, %v1042_v50  ;;  %v1039_v12 = vadd.f32 1.0, %v2566_v60 }
 0x295   :  { %v1043_v57 = vmul.f32 %v1031_v56, %v3169_v49  ;;  %v1040_v63 = vmul.f32 0.5, %v1038_v61 }
 0x296   :  { %2567 = vtanh.f32 %v3213_v55  ;;  %v1041_v1 = vmul.f32 0.5, %v1039_v12 }
 0x297   :  { %v3217_v58 = vadd.f32 %v1045_v54, %v1043_v57 }
 0x299   :  { %2569 = vtanh.f32 %v3217_v58 }
 0x2a0   :  { %v2568_v62 = vpop.eup %2567 }
 0x2a1   :  { %v1050_v3 = vmul.f32 %v2568_v62, %v1040_v63 }
 0x2a3   :  { %v2570_v2 = vpop.eup %2569 }
 0x2a4   :  { %v1051_v4 = vmul.f32 %v2570_v2, %v1041_v1 }
 0x2a6   :  { %v1063_v5 = vpack.c.bf16 %v1051_v4, %v1050_v3 }
 0x2a8   :  { %1097 = vmatmul.mubr.bf16.vlgmr.msra.gmra.mrb[8].mxu0 %v1063_v5  ;;  %1140 = vmatmul.mubr.bf16.vlgmr.msra.gmra.mrb[8].mxu1 %v1063_v5 }
 0x2a9   :  { %1207 = vmatpush1.bf16.msra.mxu0 %v2985_v15  ;;  %1250 = vmatpush1.bf16.msra.mxu1 %v2990_v16 }
 0x2aa   :  { %1208 = vmatprep.subr.bf16.mxu0 %v2999_v17  ;;  %1251 = vmatprep.subr.bf16.mxu1 %v3004_v18 }
 0x2ab   :  { %1238 = vmatprep.mubr.bf16.mxu0 %v2783_v0  ;;  %1281 = vmatprep.mubr.bf16.mxu1 %v2783_v0 }
 0x2ad   :  { %1209 = vmatpush1.bf16.msra.mxu0 %v3009_v19  ;;  %1252 = vmatpush1.bf16.msra.mxu1 %v3014_v20 }
 0x2ae   :  { %1210 = vmatprep.subr.bf16.mxu0 %v3023_v21  ;;  %1253 = vmatprep.subr.bf16.mxu1 %v3028_v22 }
 0x2b1   :  { %1211 = vmatpush1.bf16.msra.mxu0 %v3033_v23  ;;  %1254 = vmatpush1.bf16.msra.mxu1 %v3038_v24 }
 0x2b2   :  { %1212 = vmatprep.subr.bf16.mxu0 %v3047_v25  ;;  %1255 = vmatprep.subr.bf16.mxu1 %v3052_v26 }
 0x2b5   :  { %1213 = vmatpush1.bf16.msra.mxu0 %v3057_v27  ;;  %1256 = vmatpush1.bf16.msra.mxu1 %v3062_v28 }
 0x2b6   :  { %1214 = vmatprep.subr.bf16.mxu0 %v3071_v29  ;;  %1257 = vmatprep.subr.bf16.mxu1 %v3076_v30 }
 0x2b9   :  { %1215 = vmatpush1.bf16.msra.mxu0 %v3081_v31  ;;  %1258 = vmatpush1.bf16.msra.mxu1 %v3086_v33 }
 0x2ba   :  { %1216 = vmatprep.subr.bf16.mxu0 %v3095_v34  ;;  %1259 = vmatprep.subr.bf16.mxu1 %v3100_v35 }
 0x2bd   :  { %1217 = vmatpush1.bf16.msra.mxu0 %v3105_v36  ;;  %1260 = vmatpush1.bf16.msra.mxu1 %v3110_v37 }
 0x2be   :  { %1218 = vmatprep.subr.bf16.mxu0 %v3119_v38  ;;  %1261 = vmatprep.subr.bf16.mxu1 %v3124_v39 }
 0x2c1   :  { %1219 = vmatpush1.bf16.msra.mxu0 %v3129_v40  ;;  %1262 = vmatpush1.bf16.msra.mxu1 %v3134_v41 }
 0x2c2   :  { %1220 = vmatprep.subr.bf16.mxu0 %v3143_v42  ;;  %1263 = vmatprep.subr.bf16.mxu1 %v3148_v43 }
 0x2c5   :  { %1221 = vmatpush1.bf16.msra.mxu0 %v3153_v44  ;;  %1264 = vmatpush1.bf16.msra.mxu1 %v3158_v45 }
 0x2c6   :  { %1348 = vmatprep.subr.bf16.mxu0 %v2975_v13  ;;  %1391 = vmatprep.subr.bf16.mxu1 %v2980_v14 }
 0x37b   :  { %v1098_v49 = vpop.f32.mrb[8].mxu0  ;;  %v1141_v6 = vpop.f32.mrb[8].mxu1 }
 0x37c   :  { %v1158_v7 = vmul.f32 0.5, %v1098_v49  ;;  %v1100_v8 = vpop.f32.mrb[9].mxu0  ;;  %v1143_v9 = vpop.f32.mrb[9].mxu1 }
 0x37d   :  { %v1166_v11 = vmul.f32 0.5, %v1100_v8  ;;  %v1102_v46 = vpop.f32.mrb[10].mxu0  ;;  %v1145_v50 = vpop.f32.mrb[10].mxu1  ;;  %v1176_v60 = vmul.f32 0.5, %v1143_v9 }
 0x37e   :  { %2571 = vtanh.f32 %v1158_v7  ;;  %v1159_v52 = vmul.f32 0.5, %v1102_v46  ;;  %v1104_v51 = vpop.f32.mrb[11].mxu0  ;;  %v1147_v53 = vpop.f32.mrb[11].mxu1 }
 0x37f   :  { %2573 = vtanh.f32 %v1166_v11  ;;  %v1167_v56 = vmul.f32 0.5, %v1104_v51  ;;  %v1177_v12 = vmul.f32 0.5, %v1147_v53 }
 0x380   :  { %2575 = vtanh.f32 %v1159_v52 }
 0x381   :  { %2577 = vtanh.f32 %v1141_v6 }
 0x382   :  { %2579 = vtanh.f32 %v1167_v56 }
 0x383   :  { %2581 = vtanh.f32 %v1145_v50 }
 0x384   :  { %2583 = vtanh.f32 %v1176_v60 }
 0x385   :  { %2585 = vtanh.f32 %v1177_v12 }
 0x388   :  { %v2572_v54 = vpop.eup %2571 }
 0x389   :  { %v2574_v57 = vpop.eup %2573  ;;  %v1162_v59 = vadd.f32 1.0, %v2572_v54 }
 0x38a   :  { %v1170_v61 = vadd.f32 1.0, %v2574_v57  ;;  %v2576_v62 = vpop.eup %2575 }
 0x38b   :  { %v1164_v63 = vmul.f32 0.5, %v1162_v59  ;;  %v2578_v1 = vpop.eup %2577  ;;  %v1163_v3 = vadd.f32 1.0, %v2576_v62 }
 0x38c   :  { %v1172_v2 = vmul.f32 0.5, %v1170_v61  ;;  %v2580_v4 = vpop.eup %2579 }
 0x38d   :  { %v1186_v5 = vmul.f32 %v2578_v1, %v1164_v63  ;;  %v1165_v7 = vmul.f32 0.5, %v1163_v3  ;;  %v1171_v6 = vadd.f32 1.0, %v2580_v4  ;;  %v2582_v8 = vpop.eup %2581 }
 0x38e   :  { %v1184_v49 = vmul.f32 %v1172_v2, %v3213_v55  ;;  %v2584_v51 = vpop.eup %2583 }
 0x38f   :  { %v1173_v46 = vmul.f32 0.5, %v1171_v6  ;;  %v1187_v9 = vmul.f32 %v2582_v8, %v1165_v7  ;;  %v2586_v53 = vpop.eup %2585  ;;  %v1180_v56 = vadd.f32 1.0, %v2584_v51 }
 0x390   :  { %v3255_v11 = vadd.f32 %v1186_v5, %v1184_v49  ;;  %v1181_v55 = vadd.f32 1.0, %v2586_v53 }
 0x391   :  { %v1185_v50 = vmul.f32 %v1173_v46, %v3217_v58  ;;  %v1182_v57 = vmul.f32 0.5, %v1180_v56 }
 0x392   :  { %2587 = vtanh.f32 %v3255_v11  ;;  %v1183_v59 = vmul.f32 0.5, %v1181_v55 }
 0x393   :  { %v3259_v52 = vadd.f32 %v1187_v9, %v1185_v50 }
 0x395   :  { %2589 = vtanh.f32 %v3259_v52 }
 0x39c   :  { %v2588_v54 = vpop.eup %2587 }
 0x39d   :  { %v1192_v61 = vmul.f32 %v2588_v54, %v1182_v57 }
 0x39f   :  { %v2590_v60 = vpop.eup %2589 }
 0x3a0   :  { %v1193_v12 = vmul.f32 %v2590_v60, %v1183_v59 }
 0x3a2   :  { %v1205_v62 = vpack.c.bf16 %v1193_v12, %v1192_v61 }
 0x3a4   :  { %1239 = vmatmul.mubr.bf16.vlgmr.msra.gmra.mrb[12].mxu0 %v1205_v62  ;;  %1282 = vmatmul.mubr.bf16.vlgmr.msra.gmra.mrb[12].mxu1 %v1205_v62 }
 0x3a5   :  { %1349 = vmatpush1.bf16.msra.mxu0 %v2985_v15  ;;  %1392 = vmatpush1.bf16.msra.mxu1 %v2990_v16 }
 0x3a6   :  { %1350 = vmatprep.subr.bf16.mxu0 %v2999_v17  ;;  %1393 = vmatprep.subr.bf16.mxu1 %v3004_v18 }
 0x3a7   :  { %1380 = vmatprep.mubr.bf16.mxu0 %v2783_v0  ;;  %1423 = vmatprep.mubr.bf16.mxu1 %v2783_v0 }
 0x3a9   :  { %1351 = vmatpush1.bf16.msra.mxu0 %v3009_v19  ;;  %1394 = vmatpush1.bf16.msra.mxu1 %v3014_v20 }
 0x3aa   :  { %1352 = vmatprep.subr.bf16.mxu0 %v3023_v21  ;;  %1395 = vmatprep.subr.bf16.mxu1 %v3028_v22 }
 0x3ad   :  { %1353 = vmatpush1.bf16.msra.mxu0 %v3033_v23  ;;  %1396 = vmatpush1.bf16.msra.mxu1 %v3038_v24 }
 0x3ae   :  { %1354 = vmatprep.subr.bf16.mxu0 %v3047_v25  ;;  %1397 = vmatprep.subr.bf16.mxu1 %v3052_v26 }
 0x3b1   :  { %1355 = vmatpush1.bf16.msra.mxu0 %v3057_v27  ;;  %1398 = vmatpush1.bf16.msra.mxu1 %v3062_v28 }
 0x3b2   :  { %1356 = vmatprep.subr.bf16.mxu0 %v3071_v29  ;;  %1399 = vmatprep.subr.bf16.mxu1 %v3076_v30 }
 0x3b5   :  { %1357 = vmatpush1.bf16.msra.mxu0 %v3081_v31  ;;  %1400 = vmatpush1.bf16.msra.mxu1 %v3086_v33 }
 0x3b6   :  { %1358 = vmatprep.subr.bf16.mxu0 %v3095_v34  ;;  %1401 = vmatprep.subr.bf16.mxu1 %v3100_v35 }
 0x3b9   :  { %1359 = vmatpush1.bf16.msra.mxu0 %v3105_v36  ;;  %1402 = vmatpush1.bf16.msra.mxu1 %v3110_v37 }
 0x3ba   :  { %1360 = vmatprep.subr.bf16.mxu0 %v3119_v38  ;;  %1403 = vmatprep.subr.bf16.mxu1 %v3124_v39 }
 0x3bd   :  { %1361 = vmatpush1.bf16.msra.mxu0 %v3129_v40  ;;  %1404 = vmatpush1.bf16.msra.mxu1 %v3134_v41 }
 0x3be   :  { %1362 = vmatprep.subr.bf16.mxu0 %v3143_v42  ;;  %1405 = vmatprep.subr.bf16.mxu1 %v3148_v43 }
 0x3c1   :  { %1363 = vmatpush1.bf16.msra.mxu0 %v3153_v44  ;;  %1406 = vmatpush1.bf16.msra.mxu1 %v3158_v45 }
 0x3c2   :  { %1490 = vmatprep.subr.bf16.mxu0 %v2975_v13  ;;  %1533 = vmatprep.subr.bf16.mxu1 %v2980_v14 }
 0x477   :  { %v1240_v58 = vpop.f32.mrb[12].mxu0  ;;  %v1283_v63 = vpop.f32.mrb[12].mxu1 }
 0x478   :  { %v1300_v1 = vmul.f32 0.5, %v1240_v58  ;;  %v1242_v2 = vpop.f32.mrb[13].mxu0  ;;  %v1285_v3 = vpop.f32.mrb[13].mxu1 }
 0x479   :  { %v1308_v4 = vmul.f32 0.5, %v1242_v2  ;;  %v1244_v5 = vpop.f32.mrb[14].mxu0  ;;  %v1287_v49 = vpop.f32.mrb[14].mxu1  ;;  %v1318_v53 = vmul.f32 0.5, %v1285_v3 }
 0x47a   :  { %2591 = vtanh.f32 %v1300_v1  ;;  %v1301_v7 = vmul.f32 0.5, %v1244_v5  ;;  %v1246_v6 = vpop.f32.mrb[15].mxu0  ;;  %v1289_v8 = vpop.f32.mrb[15].mxu1 }
 0x47b   :  { %2593 = vtanh.f32 %v1308_v4  ;;  %v1309_v46 = vmul.f32 0.5, %v1246_v6  ;;  %v1319_v55 = vmul.f32 0.5, %v1289_v8 }
 0x47c   :  { %2595 = vtanh.f32 %v1301_v7 }
 0x47d   :  { %2597 = vtanh.f32 %v1283_v63 }
 0x47e   :  { %2599 = vtanh.f32 %v1309_v46 }
 0x47f   :  { %2601 = vtanh.f32 %v1287_v49 }
 0x480   :  { %2603 = vtanh.f32 %v1318_v53 }
 0x481   :  { %2605 = vtanh.f32 %v1319_v55 }
 0x484   :  { %v2592_v9 = vpop.eup %2591 }
 0x485   :  { %v2594_v50 = vpop.eup %2593  ;;  %v1304_v51 = vadd.f32 1.0, %v2592_v9 }
 0x486   :  { %v1312_v56 = vadd.f32 1.0, %v2594_v50  ;;  %v2596_v54 = vpop.eup %2595 }
 0x487   :  { %v1306_v57 = vmul.f32 0.5, %v1304_v51  ;;  %v2598_v59 = vpop.eup %2597  ;;  %v1305_v61 = vadd.f32 1.0, %v2596_v54 }
 0x488   :  { %v1314_v60 = vmul.f32 0.5, %v1312_v56  ;;  %v2600_v12 = vpop.eup %2599 }
 0x489   :  { %v1328_v62 = vmul.f32 %v2598_v59, %v1306_v57  ;;  %v1307_v1 = vmul.f32 0.5, %v1305_v61  ;;  %v1313_v63 = vadd.f32 1.0, %v2600_v12  ;;  %v2602_v2 = vpop.eup %2601 }
 0x48a   :  { %v1326_v58 = vmul.f32 %v1314_v60, %v3255_v11  ;;  %v2604_v6 = vpop.eup %2603 }
 0x48b   :  { %v1315_v5 = vmul.f32 0.5, %v1313_v63  ;;  %v1329_v3 = vmul.f32 %v2602_v2, %v1307_v1  ;;  %v2606_v8 = vpop.eup %2605  ;;  %v1322_v46 = vadd.f32 1.0, %v2604_v6  ;;  %v3367_v6 = vld [vmem:[%s3671_s3 + $0x2c] ss:$16 sps:$4 sm:$0xff]  }
 0x48c   :  { %v3297_v4 = vadd.f32 %v1328_v62, %v1326_v58  ;;  %v1323_v11 = vadd.f32 1.0, %v2606_v8  ;;  %v3375_v8 = vld [vmem:[%s3671_s3 + $0x20] ss:$16 sps:$4 sm:$0xff]  }
 0x48d   :  { %v1327_v49 = vmul.f32 %v1315_v5, %v3259_v52  ;;  %v1324_v50 = vmul.f32 0.5, %v1322_v46  ;;  %v3381_v46 = vld [vmem:[%s3671_s3 + $0x28] ss:$16 sps:$4 sm:$0xff]  }
 0x48e   :  { %2607 = vtanh.f32 %v3297_v4  ;;  %v1325_v51 = vmul.f32 0.5, %v1323_v11  ;;  %v3387_v11 = vld [vmem:[%s3671_s3 + $0x44] ss:$16 sps:$4 sm:$0xff]  }
 0x48f   :  { %v3301_v7 = vadd.f32 %v1329_v3, %v1327_v49  ;;  %v3349_v3 = vld [vmem:[%s3671_s3] ss:$16 sps:$4 sm:$0xff]   ;;  %v3355_v49 = vld [vmem:[%s3671_s3 + $0x8] ss:$16 sps:$4 sm:$0xff]  }
 0x491   :  { %2609 = vtanh.f32 %v3301_v7 }
 0x498   :  { %v2608_v9 = vpop.eup %2607 }
 0x499   :  { %v1334_v56 = vmul.f32 %v2608_v9, %v1324_v50  ;;  %v3393_v9 = vld [vmem:[%s3671_s3 + $0x4c] ss:$16 sps:$4 sm:$0xff]   ;;  %v3399_v50 = vld [vmem:[%s3671_s3 + $0x40] ss:$16 sps:$4 sm:$0xff]  }
 0x49b   :  { %v2610_v53 = vpop.eup %2609 }
 0x49c   :  { %v1335_v55 = vmul.f32 %v2610_v53, %v1325_v51  ;;  %v3405_v51 = vld [vmem:[%s3671_s3 + $0x48] ss:$16 sps:$4 sm:$0xff]   ;;  %v3411_v53 = vld [vmem:[%s3671_s3 + $0x64] ss:$16 sps:$4 sm:$0xff]  }
 0x49e   :  { %v1347_v54 = vpack.c.bf16 %v1335_v55, %v1334_v56  ;;  %v3417_v56 = vld [vmem:[%s3671_s3 + $0x6c] ss:$16 sps:$4 sm:$0xff]   ;;  %v3423_v55 = vld [vmem:[%s3671_s3 + $0x60] ss:$16 sps:$4 sm:$0xff]  }
 0x4a0   :  { %1381 = vmatmul.mubr.bf16.vlgmr.msra.gmra.mrb[16].mxu0 %v1347_v54  ;;  %1424 = vmatmul.mubr.bf16.vlgmr.msra.gmra.mrb[16].mxu1 %v1347_v54  ;;  %v3429_v54 = vld [vmem:[%s3671_s3 + $0x68] ss:$16 sps:$4 sm:$0xff]  }
 0x4a1   :  { %1491 = vmatpush1.bf16.msra.mxu0 %v2985_v15  ;;  %1534 = vmatpush1.bf16.msra.mxu1 %v2990_v16 }
 0x4a2   :  { %1492 = vmatprep.subr.bf16.mxu0 %v2999_v17  ;;  %1535 = vmatprep.subr.bf16.mxu1 %v3004_v18 }
 0x4a3   :  { %1522 = vmatprep.mubr.bf16.mxu0 %v2783_v0  ;;  %1565 = vmatprep.mubr.bf16.mxu1 %v2783_v0 }
 0x4a5   :  { %1493 = vmatpush1.bf16.msra.mxu0 %v3009_v19  ;;  %1536 = vmatpush1.bf16.msra.mxu1 %v3014_v20 }
 0x4a6   :  { %1494 = vmatprep.subr.bf16.mxu0 %v3023_v21  ;;  %1537 = vmatprep.subr.bf16.mxu1 %v3028_v22 }
 0x4a9   :  { %1495 = vmatpush1.bf16.msra.mxu0 %v3033_v23  ;;  %1538 = vmatpush1.bf16.msra.mxu1 %v3038_v24 }
 0x4aa   :  { %1496 = vmatprep.subr.bf16.mxu0 %v3047_v25  ;;  %1539 = vmatprep.subr.bf16.mxu1 %v3052_v26 }
 0x4ad   :  { %1497 = vmatpush1.bf16.msra.mxu0 %v3057_v27  ;;  %1540 = vmatpush1.bf16.msra.mxu1 %v3062_v28 }
 0x4ae   :  { %1498 = vmatprep.subr.bf16.mxu0 %v3071_v29  ;;  %1541 = vmatprep.subr.bf16.mxu1 %v3076_v30 }
 0x4b1   :  { %1499 = vmatpush1.bf16.msra.mxu0 %v3081_v31  ;;  %1542 = vmatpush1.bf16.msra.mxu1 %v3086_v33 }
 0x4b2   :  { %1500 = vmatprep.subr.bf16.mxu0 %v3095_v34  ;;  %1543 = vmatprep.subr.bf16.mxu1 %v3100_v35 }
 0x4b5   :  { %1501 = vmatpush1.bf16.msra.mxu0 %v3105_v36  ;;  %1544 = vmatpush1.bf16.msra.mxu1 %v3110_v37 }
 0x4b6   :  { %1502 = vmatprep.subr.bf16.mxu0 %v3119_v38  ;;  %1545 = vmatprep.subr.bf16.mxu1 %v3124_v39 }
 0x4b9   :  { %1503 = vmatpush1.bf16.msra.mxu0 %v3129_v40  ;;  %1546 = vmatpush1.bf16.msra.mxu1 %v3134_v41 }
 0x4ba   :  { %1504 = vmatprep.subr.bf16.mxu0 %v3143_v42  ;;  %1547 = vmatprep.subr.bf16.mxu1 %v3148_v43 }
 0x4bd   :  { %1505 = vmatpush1.bf16.msra.mxu0 %v3153_v44  ;;  %1548 = vmatpush1.bf16.msra.mxu1 %v3158_v45 }
 0x4be   :  { %1632 = vmatprep.subr.bf16.mxu0 %v2975_v13  ;;  %1675 = vmatprep.subr.bf16.mxu1 %v2980_v14 }
 0x573   :  { %v1382_v15 = vpop.f32.mrb[16].mxu0  ;;  %v1425_v16 = vpop.f32.mrb[16].mxu1 }
 0x574   :  { %v1442_v17 = vmul.f32 0.5, %v1382_v15  ;;  %v1384_v18 = vpop.f32.mrb[17].mxu0  ;;  %v1427_v19 = vpop.f32.mrb[17].mxu1  ;;  %v3435_v15 = vld [vmem:[%s3671_s3 + $0x84] ss:$16 sps:$4 sm:$0xff]  }
 0x575   :  { %v1450_v20 = vmul.f32 0.5, %v1384_v18  ;;  %v1386_v21 = vpop.f32.mrb[18].mxu0  ;;  %v1429_v22 = vpop.f32.mrb[18].mxu1  ;;  %v1460_v28 = vmul.f32 0.5, %v1427_v19  ;;  %v3453_v18 = vld [vmem:[%s3671_s3 + $0x88] ss:$16 sps:$4 sm:$0xff]  }
 0x576   :  { %2611 = vtanh.f32 %v1442_v17  ;;  %v1443_v23 = vmul.f32 0.5, %v1386_v21  ;;  %v1388_v24 = vpop.f32.mrb[19].mxu0  ;;  %v1431_v25 = vpop.f32.mrb[19].mxu1  ;;  %v3447_v17 = vld [vmem:[%s3671_s3 + $0x80] ss:$16 sps:$4 sm:$0xff]  }
 0x577   :  { %2613 = vtanh.f32 %v1450_v20  ;;  %v1451_v26 = vmul.f32 0.5, %v1388_v24  ;;  %v1461_v30 = vmul.f32 0.5, %v1431_v25  ;;  %v3459_v19 = vld [vmem:[%s3671_s3 + $0xa4] ss:$16 sps:$4 sm:$0xff]   ;;  %v3465_v20 = vld [vmem:[%s3671_s3 + $0xac] ss:$16 sps:$4 sm:$0xff]  }
 0x578   :  { %2615 = vtanh.f32 %v1443_v23  ;;  %v3471_v21 = vld [vmem:[%s3671_s3 + $0xa0] ss:$16 sps:$4 sm:$0xff]   ;;  %v3483_v23 = vld [vmem:[%s3671_s3 + $0xc4] ss:$16 sps:$4 sm:$0xff]   ;;  %v3489_v24 = vld [vmem:[%s3671_s3 + $0xcc] ss:$16 sps:$4 sm:$0xff]  }
 0x579   :  { %2617 = vtanh.f32 %v1425_v16  ;;  %v3441_v16 = vld [vmem:[%s3671_s3 + $0x8c] ss:$16 sps:$4 sm:$0xff]   ;;  %v3495_v25 = vld [vmem:[%s3671_s3 + $0xc0] ss:$16 sps:$4 sm:$0xff]  }
 0x57a   :  { %2619 = vtanh.f32 %v1451_v26  ;;  %v3501_v26 = vld [vmem:[%s3671_s3 + $0xc8] ss:$16 sps:$4 sm:$0xff]  }
 0x57b   :  { %2621 = vtanh.f32 %v1429_v22  ;;  %v3477_v22 = vld [vmem:[%s3671_s3 + $0xa8] ss:$16 sps:$4 sm:$0xff]  }
 0x57c   :  { %2623 = vtanh.f32 %v1460_v28  ;;  %v3525_v28 = vld [vmem:[%s3671_s3 + $0xe8] ss:$16 sps:$4 sm:$0xff]  }
 0x57d   :  { %2625 = vtanh.f32 %v1461_v30  ;;  %v2730_v30 = vld [vmem:[%s3671_s3 + $0xc] ss:$16 sps:$4 sm:$0xff]  }
 0x580   :  { %v2612_v13 = vpop.eup %2611 }
 0x581   :  { %v2614_v14 = vpop.eup %2613  ;;  %v1446_v27 = vadd.f32 1.0, %v2612_v13  ;;  %v3507_v13 = vld [vmem:[%s3671_s3 + $0xe4] ss:$16 sps:$4 sm:$0xff]  }
 0x582   :  { %v1454_v29 = vadd.f32 1.0, %v2614_v14  ;;  %v2616_v31 = vpop.eup %2615  ;;  %v3513_v14 = vld [vmem:[%s3671_s3 + $0xec] ss:$16 sps:$4 sm:$0xff]  }
 0x583   :  { %v1448_v33 = vmul.f32 0.5, %v1446_v27  ;;  %v2618_v34 = vpop.eup %2617  ;;  %v1447_v36 = vadd.f32 1.0, %v2616_v31  ;;  %v3519_v27 = vld [vmem:[%s3671_s3 + $0xe0] ss:$16 sps:$4 sm:$0xff]  }
 0x584   :  { %v1456_v35 = vmul.f32 0.5, %v1454_v29  ;;  %v2620_v37 = vpop.eup %2619  ;;  %v2729_v29 = vld [vmem:[%s3671_s3 + $0x4] ss:$16 sps:$4 sm:$0xff]  }
 0x585   :  { %v1470_v38 = vmul.f32 %v2618_v34, %v1448_v33  ;;  %v1449_v40 = vmul.f32 0.5, %v1447_v36  ;;  %v1455_v41 = vadd.f32 1.0, %v2620_v37  ;;  %v2622_v42 = vpop.eup %2621 }
 0x586   :  { %v1468_v39 = vmul.f32 %v1456_v35, %v3297_v4  ;;  %v2624_v59 = vpop.eup %2623 }
 0x587   :  { %v1457_v44 = vmul.f32 0.5, %v1455_v41  ;;  %v1471_v45 = vmul.f32 %v2622_v42, %v1449_v40  ;;  %v2626_v60 = vpop.eup %2625  ;;  %v1464_v61 = vadd.f32 1.0, %v2624_v59 }
 0x588   :  { %v3339_v43 = vadd.f32 %v1470_v38, %v1468_v39  ;;  %v1465_v12 = vadd.f32 1.0, %v2626_v60 }
 0x589   :  { %v1469_v52 = vmul.f32 %v1457_v44, %v3301_v7  ;;  %v1466_v58 = vmul.f32 0.5, %v1464_v61  ;;  %v3361_v7 = vld [vmem:[%s3671_s3 + $0x24] ss:$16 sps:$4 sm:$0xff]  }
 0x58a   :  { %2627 = vtanh.f32 %v3339_v43  ;;  %v1467_v1 = vmul.f32 0.5, %v1465_v12 }
 0x58b   :  { %v3343_v57 = vadd.f32 %v1471_v45, %v1469_v52 }
 0x58d   :  { %2629 = vtanh.f32 %v3343_v57 }
 0x594   :  { %v2628_v62 = vpop.eup %2627 }
 0x595   :  { %v1476_v2 = vmul.f32 %v2628_v62, %v1466_v58 }
 0x597   :  { %v2630_v63 = vpop.eup %2629 }
 0x598   :  { %v1477_v4 = vmul.f32 %v2630_v63, %v1467_v1 }
 0x59a   :  { %v1489_v5 = vpack.c.bf16 %v1477_v4, %v1476_v2 }
 0x59c   :  { %1523 = vmatmul.mubr.bf16.vlgmr.msra.gmra.mrb[20].mxu0 %v1489_v5  ;;  %1566 = vmatmul.mubr.bf16.vlgmr.msra.gmra.mrb[20].mxu1 %v1489_v5 }
 0x59d   :  { %1633 = vmatpush1.bf16.msra.mxu0 %v3349_v3  ;;  %1676 = vmatpush1.bf16.msra.mxu1 %v3355_v49 }
 0x59e   :  { %1634 = vmatprep.subr.bf16.mxu0 %v3361_v7  ;;  %1677 = vmatprep.subr.bf16.mxu1 %v3367_v6 }
 0x59f   :  { %1664 = vmatprep.mubr.bf16.mxu0 %v2783_v0  ;;  %1707 = vmatprep.mubr.bf16.mxu1 %v2783_v0 }
 0x5a1   :  { %1635 = vmatpush1.bf16.msra.mxu0 %v3375_v8  ;;  %1678 = vmatpush1.bf16.msra.mxu1 %v3381_v46 }
 0x5a2   :  { %1636 = vmatprep.subr.bf16.mxu0 %v3387_v11  ;;  %1679 = vmatprep.subr.bf16.mxu1 %v3393_v9 }
 0x5a5   :  { %1637 = vmatpush1.bf16.msra.mxu0 %v3399_v50  ;;  %1680 = vmatpush1.bf16.msra.mxu1 %v3405_v51 }
 0x5a6   :  { %1638 = vmatprep.subr.bf16.mxu0 %v3411_v53  ;;  %1681 = vmatprep.subr.bf16.mxu1 %v3417_v56 }
 0x5a9   :  { %1639 = vmatpush1.bf16.msra.mxu0 %v3423_v55  ;;  %1682 = vmatpush1.bf16.msra.mxu1 %v3429_v54 }
 0x5aa   :  { %1640 = vmatprep.subr.bf16.mxu0 %v3435_v15  ;;  %1683 = vmatprep.subr.bf16.mxu1 %v3441_v16 }
 0x5ad   :  { %1641 = vmatpush1.bf16.msra.mxu0 %v3447_v17  ;;  %1684 = vmatpush1.bf16.msra.mxu1 %v3453_v18 }
 0x5ae   :  { %1642 = vmatprep.subr.bf16.mxu0 %v3459_v19  ;;  %1685 = vmatprep.subr.bf16.mxu1 %v3465_v20 }
 0x5b1   :  { %1643 = vmatpush1.bf16.msra.mxu0 %v3471_v21  ;;  %1686 = vmatpush1.bf16.msra.mxu1 %v3477_v22 }
 0x5b2   :  { %1644 = vmatprep.subr.bf16.mxu0 %v3483_v23  ;;  %1687 = vmatprep.subr.bf16.mxu1 %v3489_v24 }
 0x5b5   :  { %1645 = vmatpush1.bf16.msra.mxu0 %v3495_v25  ;;  %1688 = vmatpush1.bf16.msra.mxu1 %v3501_v26 }
 0x5b6   :  { %1646 = vmatprep.subr.bf16.mxu0 %v3507_v13  ;;  %1689 = vmatprep.subr.bf16.mxu1 %v3513_v14 }
 0x5b9   :  { %1647 = vmatpush1.bf16.msra.mxu0 %v3519_v27  ;;  %1690 = vmatpush1.bf16.msra.mxu1 %v3525_v28 }
 0x5ba   :  { %1774 = vmatprep.subr.bf16.mxu0 %v2729_v29  ;;  %1817 = vmatprep.subr.bf16.mxu1 %v2730_v30 }
 0x66f   :  { %v1524_v31 = vpop.f32.mrb[20].mxu0  ;;  %v1567_v33 = vpop.f32.mrb[20].mxu1 }
 0x670   :  { %v1584_v34 = vmul.f32 0.5, %v1524_v31  ;;  %v1526_v35 = vpop.f32.mrb[21].mxu0  ;;  %v1569_v36 = vpop.f32.mrb[21].mxu1 }
 0x671   :  { %v1592_v37 = vmul.f32 0.5, %v1526_v35  ;;  %v1528_v38 = vpop.f32.mrb[22].mxu0  ;;  %v1571_v39 = vpop.f32.mrb[22].mxu1  ;;  %v1602_v60 = vmul.f32 0.5, %v1569_v36 }
 0x672   :  { %2631 = vtanh.f32 %v1584_v34  ;;  %v1585_v40 = vmul.f32 0.5, %v1528_v38  ;;  %v1530_v41 = vpop.f32.mrb[23].mxu0  ;;  %v1573_v42 = vpop.f32.mrb[23].mxu1 }
 0x673   :  { %2633 = vtanh.f32 %v1592_v37  ;;  %v1593_v44 = vmul.f32 0.5, %v1530_v41  ;;  %v1603_v12 = vmul.f32 0.5, %v1573_v42 }
 0x674   :  { %2635 = vtanh.f32 %v1585_v40 }
 0x675   :  { %2637 = vtanh.f32 %v1567_v33 }
 0x676   :  { %2639 = vtanh.f32 %v1593_v44 }
 0x677   :  { %2641 = vtanh.f32 %v1571_v39 }
 0x678   :  { %2643 = vtanh.f32 %v1602_v60 }
 0x679   :  { %2645 = vtanh.f32 %v1603_v12 }
 0x67c   :  { %v2632_v45 = vpop.eup %2631 }
 0x67d   :  { %v2634_v52 = vpop.eup %2633  ;;  %v1588_v59 = vadd.f32 1.0, %v2632_v45 }
 0x67e   :  { %v1596_v61 = vadd.f32 1.0, %v2634_v52  ;;  %v2636_v62 = vpop.eup %2635 }
 0x67f   :  { %v1590_v58 = vmul.f32 0.5, %v1588_v59  ;;  %v2638_v1 = vpop.eup %2637  ;;  %v1589_v2 = vadd.f32 1.0, %v2636_v62 }
 0x680   :  { %v1598_v63 = vmul.f32 0.5, %v1596_v61  ;;  %v2640_v4 = vpop.eup %2639 }
 0x681   :  { %v1612_v5 = vmul.f32 %v2638_v1, %v1590_v58  ;;  %v1591_v30 = vmul.f32 0.5, %v1589_v2  ;;  %v1597_v31 = vadd.f32 1.0, %v2640_v4  ;;  %v2642_v33 = vpop.eup %2641 }
 0x682   :  { %v1610_v29 = vmul.f32 %v1598_v63, %v3339_v43  ;;  %v2644_v39 = vpop.eup %2643 }
 0x683   :  { %v1599_v35 = vmul.f32 0.5, %v1597_v31  ;;  %v1613_v36 = vmul.f32 %v2642_v33, %v1591_v30  ;;  %v2646_v40 = vpop.eup %2645  ;;  %v1606_v41 = vadd.f32 1.0, %v2644_v39  ;;  %v2499_v39 = vld [vmem:[%s3673_s5 + $0x20] sm:$0xff]  }
 0x684   :  { %v3535_v34 = vadd.f32 %v1612_v5, %v1610_v29  ;;  %v1607_v43 = vadd.f32 1.0, %v2646_v40  ;;  %v2500_v40 = vld [vmem:[%s3673_s5 + $0x28] sm:$0xff]  }
 0x685   :  { %v1611_v37 = vmul.f32 %v1599_v35, %v3343_v57  ;;  %v1608_v44 = vmul.f32 0.5, %v1606_v41  ;;  %v2501_v41 = vld [vmem:[%s3673_s5 + $0x30] sm:$0xff]  }
 0x686   :  { %2647 = vtanh.f32 %v3535_v34  ;;  %v1609_v45 = vmul.f32 0.5, %v1607_v43  ;;  %v2502_v43 = vld [vmem:[%s3673_s5 + $0x38] sm:$0xff]  }
 0x687   :  { %v3539_v38 = vadd.f32 %v1613_v36, %v1611_v37  ;;  %v2496_v36 = vld [vmem:[%s3673_s5 + $0x8] sm:$0xff]   ;;  %v2497_v37 = vld [vmem:[%s3673_s5 + $0x10] sm:$0xff]  }
 0x689   :  { %2649 = vtanh.f32 %v3539_v38 }
 0x690   :  { %v2648_v42 = vpop.eup %2647 }
 0x691   :  { %v1618_v59 = vmul.f32 %v2648_v42, %v1608_v44  ;;  %v2503_v42 = vld [vmem:[%s3672_s4] sm:$0xff]   ;;  %v2504_v44 = vld [vmem:[%s3672_s4 + $0x8] sm:$0xff]  }
 0x693   :  { %v2650_v52 = vpop.eup %2649 }
 0x694   :  { %v1619_v60 = vmul.f32 %v2650_v52, %v1609_v45  ;;  %v2505_v45 = vld [vmem:[%s3672_s4 + $0x10] sm:$0xff]  }
 0x695   :  { %v2509_v52 = vld [vmem:[%s3672_s4 + $0x30] sm:$0xff]  }
 0x696   :  { %v1631_v61 = vpack.c.bf16 %v1619_v60, %v1618_v59  ;;  %v2510_v59 = vld [vmem:[%s3672_s4 + $0x38] sm:$0xff]  }
 0x698   :  { %1665 = vmatmul.mubr.bf16.vlgmr.msra.gmra.mrb[24].mxu0 %v1631_v61  ;;  %1708 = vmatmul.mubr.bf16.vlgmr.msra.gmra.mrb[24].mxu1 %v1631_v61 }
 0x699   :  { %1775 = vmatpush1.bf16.msra.mxu0 %v3349_v3  ;;  %1818 = vmatpush1.bf16.msra.mxu1 %v3355_v49 }
 0x69a   :  { %1776 = vmatprep.subr.bf16.mxu0 %v3361_v7  ;;  %1819 = vmatprep.subr.bf16.mxu1 %v3367_v6 }
 0x69b   :  { %1806 = vmatprep.mubr.bf16.mxu0 %v2783_v0  ;;  %1849 = vmatprep.mubr.bf16.mxu1 %v2783_v0 }
 0x69d   :  { %1777 = vmatpush1.bf16.msra.mxu0 %v3375_v8  ;;  %1820 = vmatpush1.bf16.msra.mxu1 %v3381_v46 }
 0x69e   :  { %1778 = vmatprep.subr.bf16.mxu0 %v3387_v11  ;;  %1821 = vmatprep.subr.bf16.mxu1 %v3393_v9 }
 0x6a1   :  { %1779 = vmatpush1.bf16.msra.mxu0 %v3399_v50  ;;  %1822 = vmatpush1.bf16.msra.mxu1 %v3405_v51 }
 0x6a2   :  { %1780 = vmatprep.subr.bf16.mxu0 %v3411_v53  ;;  %1823 = vmatprep.subr.bf16.mxu1 %v3417_v56 }
 0x6a5   :  { %1781 = vmatpush1.bf16.msra.mxu0 %v3423_v55  ;;  %1824 = vmatpush1.bf16.msra.mxu1 %v3429_v54 }
 0x6a6   :  { %1782 = vmatprep.subr.bf16.mxu0 %v3435_v15  ;;  %1825 = vmatprep.subr.bf16.mxu1 %v3441_v16 }
 0x6a9   :  { %1783 = vmatpush1.bf16.msra.mxu0 %v3447_v17  ;;  %1826 = vmatpush1.bf16.msra.mxu1 %v3453_v18 }
 0x6aa   :  { %1784 = vmatprep.subr.bf16.mxu0 %v3459_v19  ;;  %1827 = vmatprep.subr.bf16.mxu1 %v3465_v20 }
 0x6ad   :  { %1785 = vmatpush1.bf16.msra.mxu0 %v3471_v21  ;;  %1828 = vmatpush1.bf16.msra.mxu1 %v3477_v22 }
 0x6ae   :  { %1786 = vmatprep.subr.bf16.mxu0 %v3483_v23  ;;  %1829 = vmatprep.subr.bf16.mxu1 %v3489_v24 }
 0x6b1   :  { %1787 = vmatpush1.bf16.msra.mxu0 %v3495_v25  ;;  %1830 = vmatpush1.bf16.msra.mxu1 %v3501_v26 }
 0x6b2   :  { %1788 = vmatprep.subr.bf16.mxu0 %v3507_v13  ;;  %1831 = vmatprep.subr.bf16.mxu1 %v3513_v14 }
 0x6b5   :  { %1789 = vmatpush1.bf16.msra.mxu0 %v3519_v27  ;;  %1832 = vmatpush1.bf16.msra.mxu1 %v3525_v28 }
 0x6b6   :  { %2318 = vmatprep.subr.bf16.mxu0 %v2784_v32  ;;  %2338 = vmatprep.subr.bf16.mxu1 %v2784_v32 }
 0x76b   :  { %v1666_v0 = vpop.f32.mrb[24].mxu0  ;;  %v1709_v57 = vpop.f32.mrb[24].mxu1 }
 0x76c   :  { %v1726_v3 = vmul.f32 0.5, %v1666_v0  ;;  %v1668_v49 = vpop.f32.mrb[25].mxu0  ;;  %v1711_v7 = vpop.f32.mrb[25].mxu1 }
 0x76d   :  { %v1734_v6 = vmul.f32 0.5, %v1668_v49  ;;  %v1670_v8 = vpop.f32.mrb[26].mxu0  ;;  %v1713_v46 = vpop.f32.mrb[26].mxu1  ;;  %v1744_v54 = vmul.f32 0.5, %v1711_v7 }
 0x76e   :  { %2651 = vtanh.f32 %v1726_v3  ;;  %v1727_v11 = vmul.f32 0.5, %v1670_v8  ;;  %v1672_v9 = vpop.f32.mrb[27].mxu0  ;;  %v1715_v50 = vpop.f32.mrb[27].mxu1 }
 0x76f   :  { %2653 = vtanh.f32 %v1734_v6  ;;  %v1735_v51 = vmul.f32 0.5, %v1672_v9  ;;  %v1745_v16 = vmul.f32 0.5, %v1715_v50 }
 0x770   :  { %2655 = vtanh.f32 %v1727_v11 }
 0x771   :  { %2657 = vtanh.f32 %v1709_v57 }
 0x772   :  { %2659 = vtanh.f32 %v1735_v51 }
 0x773   :  { %2661 = vtanh.f32 %v1713_v46 }
 0x774   :  { %2663 = vtanh.f32 %v1744_v54 }
 0x775   :  { %2665 = vtanh.f32 %v1745_v16 }
 0x778   :  { %v2652_v53 = vpop.eup %2651 }
 0x779   :  { %v2654_v56 = vpop.eup %2653  ;;  %v1730_v55 = vadd.f32 1.0, %v2652_v53 }
 0x77a   :  { %v1738_v15 = vadd.f32 1.0, %v2654_v56  ;;  %v2656_v17 = vpop.eup %2655 }
 0x77b   :  { %v1732_v18 = vmul.f32 0.5, %v1730_v55  ;;  %v2658_v19 = vpop.eup %2657  ;;  %v1731_v21 = vadd.f32 1.0, %v2656_v17 }
 0x77c   :  { %v1740_v20 = vmul.f32 0.5, %v1738_v15  ;;  %v2660_v22 = vpop.eup %2659 }
 0x77d   :  { %v1754_v23 = vmul.f32 %v2658_v19, %v1732_v18  ;;  %v1733_v25 = vmul.f32 0.5, %v1731_v21  ;;  %v1739_v26 = vadd.f32 1.0, %v2660_v22  ;;  %v2662_v13 = vpop.eup %2661 }
 0x77e   :  { %v1752_v24 = vmul.f32 %v1740_v20, %v3535_v34  ;;  %v2664_v58 = vpop.eup %2663  ;;  %v2495_v34 = vld [vmem:[%s3673_s5] sm:$0xff]  }
 0x77f   :  { %v1741_v27 = vmul.f32 0.5, %v1739_v26  ;;  %v1755_v28 = vmul.f32 %v2662_v13, %v1733_v25  ;;  %v2666_v1 = vpop.eup %2665  ;;  %v1748_v63 = vadd.f32 1.0, %v2664_v58 }
 0x780   :  { %v3577_v14 = vadd.f32 %v1754_v23, %v1752_v24  ;;  %v1749_v2 = vadd.f32 1.0, %v2666_v1 }
 0x781   :  { %v1753_v12 = vmul.f32 %v1741_v27, %v3539_v38  ;;  %v1750_v5 = vmul.f32 0.5, %v1748_v63  ;;  %v2498_v38 = vld [vmem:[%s3673_s5 + $0x18] sm:$0xff]  }
 0x782   :  { %2667 = vtanh.f32 %v3577_v14  ;;  %v1751_v29 = vmul.f32 0.5, %v1749_v2 }
 0x783   :  { %v3581_v62 = vadd.f32 %v1755_v28, %v1753_v12 }
 0x785   :  { %2669 = vtanh.f32 %v3581_v62 }
 0x78c   :  { %v2668_v4 = vpop.eup %2667 }
 0x78d   :  { %v1760_v31 = vmul.f32 %v2668_v4, %v1750_v5 }
 0x78f   :  { %v2670_v30 = vpop.eup %2669 }
 0x790   :  { %v1761_v33 = vmul.f32 %v2670_v30, %v1751_v29 }
 0x792   :  { %v1773_v35 = vpack.c.bf16 %v1761_v33, %v1760_v31 }
 0x794   :  { %1807 = vmatmul.mubr.bf16.vlgmr.msra.gmra.mrb[28].mxu0 %v1773_v35  ;;  %1850 = vmatmul.mubr.bf16.vlgmr.msra.gmra.mrb[28].mxu1 %v1773_v35 }
 0x795   :  { %2319 = vmatpush3.bf16.msra.mxu0 %v2495_v34  ;;  %2334 = vmatprep.mubr.msk.bf16.mxu0 %vm2785_vm1, %v2784_v32 }
 0x796   :  { %2320 = vmatprep.subr.bf16.mxu0 %v2784_v32  ;;  %2354 = vmatprep.mubr.msk.bf16.mxu1 %vm2785_vm1, %v2784_v32 }
 0x797   :  { %2339 = vmatpush3.bf16.msra.mxu1 %v2503_v42 }
 0x798   :  { %2340 = vmatprep.subr.bf16.mxu1 %v2784_v32 }
 0x799   :  { %2321 = vmatpush3.bf16.msra.mxu0 %v2496_v36 }
 0x79a   :  { %2322 = vmatprep.subr.bf16.mxu0 %v2784_v32 }
 0x79b   :  { %2341 = vmatpush3.bf16.msra.mxu1 %v2504_v44 }
 0x79c   :  { %2342 = vmatprep.subr.bf16.mxu1 %v2784_v32 }
 0x79d   :  { %2323 = vmatpush3.bf16.msra.mxu0 %v2497_v37 }
 0x79e   :  { %2324 = vmatprep.subr.bf16.mxu0 %v2784_v32 }
 0x79f   :  { %2343 = vmatpush3.bf16.msra.mxu1 %v2505_v45 }
 0x7a0   :  { %2344 = vmatprep.subr.bf16.mxu1 %v2784_v32 }
 0x7a1   :  { %2325 = vmatpush3.bf16.msra.mxu0 %v2498_v38 }
 0x7a2   :  { %2326 = vmatprep.subr.bf16.mxu0 %v2784_v32 }
 0x7a3   :  { %2345 = vmatpush3.bf16.msra.mxu1 %v2506_v10 }
 0x7a4   :  { %2346 = vmatprep.subr.bf16.mxu1 %v2784_v32 }
 0x7a5   :  { %2327 = vmatpush3.bf16.msra.mxu0 %v2499_v39 }
 0x7a6   :  { %2328 = vmatprep.subr.bf16.mxu0 %v2784_v32 }
 0x7a7   :  { %2347 = vmatpush3.bf16.msra.mxu1 %v2507_v47 }
 0x7a8   :  { %2348 = vmatprep.subr.bf16.mxu1 %v2784_v32 }
 0x7a9   :  { %2329 = vmatpush3.bf16.msra.mxu0 %v2500_v40 }
 0x7aa   :  { %2330 = vmatprep.subr.bf16.mxu0 %v2784_v32 }
 0x7ad   :  { %2331 = vmatpush3.bf16.msra.mxu0 %v2501_v41 }
 0x7ae   :  { %2332 = vmatprep.subr.bf16.mxu0 %v2784_v32 }
 0x7b1   :  { %2333 = vmatpush3.bf16.msra.mxu0 %v2502_v43 }
 0x7b4   :  { %2335 = vmatmul.mubr.bf16.vlgmr.msra.gmra.mrb[36].mxu0 %v1957_v48  ;;  %v2508_v48 = vld [vmem:[%s3672_s4 + $0x28] sm:$0xff]  }
 0x7b5   :  { %2349 = vmatpush3.bf16.msra.mxu1 %v2508_v48 }
 0x7b6   :  { %2350 = vmatprep.subr.bf16.mxu1 %v2784_v32 }
 0x7b9   :  { %2351 = vmatpush3.bf16.msra.mxu1 %v2509_v52 }
 0x7ba   :  { %2352 = vmatprep.subr.bf16.mxu1 %v2784_v32 }
 0x7bd   :  { %2353 = vmatpush3.bf16.msra.mxu1 %v2510_v59 }
 0x867   :  { %v1808_v60 = vpop.f32.mrb[28].mxu0  ;;  %v1851_v61 = vpop.f32.mrb[28].mxu1 }
 0x868   :  { %v1868_v0 = vmul.f32 0.5, %v1808_v60  ;;  %v1810_v57 = vpop.f32.mrb[29].mxu0  ;;  %v1853_v3 = vpop.f32.mrb[29].mxu1 }
 0x869   :  { %v1876_v49 = vmul.f32 0.5, %v1810_v57  ;;  %v1812_v7 = vpop.f32.mrb[30].mxu0  ;;  %v1855_v6 = vpop.f32.mrb[30].mxu1  ;;  %v1886_v32 = vmul.f32 0.5, %v1853_v3 }
 0x86a   :  { %2671 = vtanh.f32 %v1868_v0  ;;  %v1869_v8 = vmul.f32 0.5, %v1812_v7  ;;  %v1814_v46 = vpop.f32.mrb[31].mxu0  ;;  %v1857_v11 = vpop.f32.mrb[31].mxu1 }
 0x86b   :  { %2673 = vtanh.f32 %v1876_v49  ;;  %v1877_v9 = vmul.f32 0.5, %v1814_v46  ;;  %v1887_v55 = vmul.f32 0.5, %v1857_v11 }
 0x86c   :  { %2675 = vtanh.f32 %v1869_v8 }
 0x86d   :  { %2677 = vtanh.f32 %v1851_v61 }
 0x86e   :  { %2679 = vtanh.f32 %v1877_v9 }
 0x86f   :  { %2681 = vtanh.f32 %v1855_v6 }
 0x870   :  { %2683 = vtanh.f32 %v1886_v32 }
 0x871   :  { %2685 = vtanh.f32 %v1887_v55 }
 0x874   :  { %v2672_v50 = vpop.eup %2671 }
 0x875   :  { %v2674_v51 = vpop.eup %2673  ;;  %v1872_v53 = vadd.f32 1.0, %v2672_v50 }
 0x876   :  { %v1880_v56 = vadd.f32 1.0, %v2674_v51  ;;  %v2676_v54 = vpop.eup %2675 }
 0x877   :  { %v1874_v15 = vmul.f32 0.5, %v1872_v53  ;;  %v2678_v16 = vpop.eup %2677  ;;  %v1873_v18 = vadd.f32 1.0, %v2676_v54 }
 0x878   :  { %v1882_v17 = vmul.f32 0.5, %v1880_v56  ;;  %v2680_v19 = vpop.eup %2679 }
 0x879   :  { %v1896_v20 = vmul.f32 %v2678_v16, %v1874_v15  ;;  %v1875_v22 = vmul.f32 0.5, %v1873_v18  ;;  %v1881_v23 = vadd.f32 1.0, %v2680_v19  ;;  %v2682_v24 = vpop.eup %2681 }
 0x87a   :  { %v1894_v21 = vmul.f32 %v1882_v17, %v3577_v14  ;;  %v2684_v28 = vpop.eup %2683 }
 0x87b   :  { %v1883_v26 = vmul.f32 0.5, %v1881_v23  ;;  %v1897_v13 = vmul.f32 %v2682_v24, %v1875_v22  ;;  %v1890_v58 = vadd.f32 1.0, %v2684_v28  ;;  %v2686_v1 = vpop.eup %2685 }
 0x87c   :  { %v1898_v25 = vadd.f32 %v1896_v20, %v1894_v21  ;;  %v1891_v2 = vadd.f32 1.0, %v2686_v1 }
 0x87d   :  { %v1895_v27 = vmul.f32 %v1883_v26, %v3581_v62  ;;  %v1892_v63 = vmul.f32 0.5, %v1890_v58  ;;  %v2299_v62 = vld [vmem:[%s3674_s6] ss:$0 sm:$0xff] }
 0x87e   :  { %2687 = vtanh.f32 %v1898_v25  ;;  %v1893_v33 = vmul.f32 0.5, %v1891_v2 }
 0x87f   :  { %v1899_v12 = vadd.f32 %v1897_v13, %v1895_v27 }
 0x881   :  { %2689 = vtanh.f32 %v1899_v12 }
 0x887   :  { %v2056_v4 = vpop.f32.mrb[36].mxu0 }
 0x888   :  { %v2688_v5 = vpop.eup %2687  ;;  %v2336_v14 = vpop.f32.mrb[37].mxu0 }
 0x889   :  { %v1902_v29 = vmul.f32 %v2688_v5, %v1892_v63  ;;  %v2059_v30 = vpop.f32.mrb[38].mxu0 }
 0x88a   :  { %v2337_v31 = vpop.f32.mrb[39].mxu0 }
 0x88b   :  { %v2690_v34 = vpop.eup %2689 }
 0x88c   :  { %v1903_v35 = vmul.f32 %v2690_v34, %v1893_v33 }
 0x88e   :  { %v1940_v36 = vpack.c.bf16 %v1903_v35, %v1902_v29 }
 0x890   :  { %2355 = vmatmul.mubr.bf16.vlgmr.msra.gmra.mrb[36].mxu1 %v1940_v36 }
 0x963   :  { %v2145_v37 = vpop.f32.mrb[36].mxu1 }
 0x964   :  { %v2146_v38 = vadd.f32 %v2145_v37, %v2056_v4  ;;  %v2356_v39 = vpop.f32.mrb[37].mxu1 }
 0x965   :  { %v2148_v40 = vpop.f32.mrb[38].mxu1 }
 0x966   :  { %v2149_v41 = vadd.f32 %v2148_v40, %v2059_v30  ;;  %v2357_v43 = vpop.f32.mrb[39].mxu1  ;;  %v2159_v42 = vadd.f32 %v2299_v62, %v2146_v38 }
 0x968   :  { %v2162_v44 = vsel %vm2161_vm2, %v2159_v42, -inf  ;;  %v2160_v45 = vadd.f32 %v2299_v62, %v2149_v41 }
 0x969   :  { %2163 = vmax.xlane.f32.xlu0 %v2162_v44 }
 0x96a   :  { %v2165_v10 = vsel %vm2161_vm2, %v2160_v45, -inf }
 0x96b   :  { %2166 = vmax.xlane.f32.xlu1 %v2165_v10 }
 0x9f6   :  { %v2164_v47 = vpop.xlane.xlu0 %2163 }
 0x9f7   :  { %v2168_v48 = vsub.f32 %v2159_v42, %v2164_v47 }
 0x9f8   :  { %v2167_v52 = vpop.xlane.xlu1 %2166 }
 0x9f9   :  { %v2170_v59 = vmul.f32 1.442695, %v2168_v48  ;;  %v2169_v60 = vsub.f32 %v2160_v45, %v2167_v52 }
 0x9fb   :  { %2691 = vpow2.f32 %v2170_v59  ;;  %v2172_v61 = vmul.f32 1.442695, %v2169_v60 }
 0x9fd   :  { %2693 = vpow2.f32 %v2172_v61 }
 0xa05   :  { %v2692_v0 = vpop.eup %2691 }
 0xa06   :  { %v2174_v57 = vsel %vm2161_vm2, %v2692_v0, 0.0 }
 0xa07   :  { %v2694_v3 = vpop.eup %2693  ;;  %2175 = vadd.xlane.f32.xlu0 %v2174_v57 }
 0xa08   :  { %v2177_v49 = vsel %vm2161_vm2, %v2694_v3, 0.0 }
 0xa0b   :  { %2178 = vadd.xlane.f32.xlu0 %v2177_v49 }
 0xa94   :  { %v2176_v7 = vpop.xlane.xlu0 %2175 }
 0xa95   :  { %2695 = vlog2.f32 %v2176_v7 }
 0xa98   :  { %v2179_v6 = vpop.xlane.xlu0 %2178 }
 0xa99   :  { %2697 = vlog2.f32 %v2179_v6 }
 0xa9f   :  { %v2696_v8 = vpop.eup %2695 }
 0xaa0   :  { %v2181_v46 = vmul.f32 0.6931472, %v2696_v8 }
 0xaa2   :  { %v2184_v11 = vsub.f32 %v2168_v48, %v2181_v46 }
 0xaa3   :  { %v2698_v9 = vpop.eup %2697 }
 0xaa4   :  { %2186 = vst.msk [vmem:[%s3675_s7] sm:$0xff] %vm2161_vm2, %v2184_v11  ;;  %v2183_v32 = vmul.f32 0.6931472, %v2698_v9 }
 0xaa6   :  { %v2185_v50 = vsub.f32 %v2169_v60, %v2183_v32 }
 0xaa8   :  { %2187 = vst.msk [vmem:[%s3675_s7 + $0x8] sm:$0xff] %vm2161_vm2, %v2185_v50 }
 0xaa9   :  { %2192 = vsyncpa [#allocation4], 1 }
 0xaaa   :  { %2193 = vsyncpa [#allocation6], 1 }

</bundles_post_ra>
